<compile_context>
chip_gen: v6e
topology: v6e:2x2x1
jax: 0.10.0
libtpu: 0.0.40
codegen_flags: <defaults>
</compile_context>

<pallas_src>
import functools

import jax
import jax.numpy as jnp
import numpy as np
from jax.experimental import pallas as pl
from jax.experimental.pallas import tpu as pltpu


def _choose_td(depth, L, budget_bytes=4 * 1024 * 1024):
    """Largest depth-tile whose padded logits slab fits `budget_bytes` per buffer."""
    # One depth row of a logits tile in VMEM: L padded to 8 sublanes, the
    # 33-wide class dim padded to 128 lanes, f32.
    row_bytes = ((L + 7) // 8) * 8 * 128 * 4
    cap = max(1, budget_bytes // row_bytes)
    if depth <= cap:
        return depth
    best = None
    t = 8
    while t <= min(depth, cap):
        if depth % t == 0:
            best = t  # multiple of 8 -> satisfies the (8,128) sublane rule
        t += 8
    if best is not None:
        return best
    # TODO(synk): depth has no multiple-of-8 divisor within the VMEM budget;
    # fall back to a full-depth tile (may exceed the per-buffer budget).
    return depth


def _critic_kernel(tok_ref, w_ref, logit_ref, perm_ref, mu_ref, lv_ref,
                   total_ref, recon_ref, permloss_ref, kld_ref, ppl_ref,
                   ce_acc, ppl_acc, cnt_acc,
                   *, alpha, beta, perm_eps, perm_rows, kld_batch, td):
    b = pl.program_id(0)
    d = pl.program_id(1)
    first = (b == 0) & (d == 0)
    last = (b == pl.num_programs(0) - 1) & (d == pl.num_programs(1) - 1)

    @pl.when(first)
    def _init():
        ce_acc[...] = jnp.zeros_like(ce_acc)
        ppl_acc[...] = jnp.zeros_like(ppl_acc)
        cnt_acc[...] = jnp.zeros_like(cnt_acc)

    # ---------- streamed masked cross-entropy over one (1, TD, L, C) tile ----
    logits = logit_ref[...].astype(jnp.float32)            # (1, TD, L, C)
    tok = tok_ref[...]                                      # (1, TD, L) int32
    w = w_ref[...].astype(jnp.float32)[..., None]           # (1, 1, L, 1) 1.0 = keep

    m = jnp.max(logits, axis=-1, keepdims=True)
    lse = m + jnp.log(jnp.sum(jnp.exp(logits - m), axis=-1, keepdims=True))
    cls = jax.lax.broadcasted_iota(jnp.int32, logits.shape, 3)
    tgt = jnp.sum(jnp.where(cls == tok[..., None], logits, 0.0),
                  axis=-1, keepdims=True)
    ce = lse - tgt                                          # (1, TD, L, 1)

    keep = w > 0.0
    ce_acc[...] = ce_acc[...] + jnp.sum(ce * w)
    # exp only on kept positions (avoids inf*0 on masked outliers).
    ppl_acc[...] = ppl_acc[...] + jnp.sum(jnp.exp(jnp.where(keep, ce, 0.0)) * w)
    # each kept (b, l) column counts once per depth row in this tile
    cnt_acc[...] = cnt_acc[...] + jnp.sum(w) * float(td)

    # ---------- tiny side losses + finalize, only on the last grid step ------
    @pl.when(last)
    def _finalize():
        # permutation-matrix penalty: entropy_col.mean() + entropy_row.mean()
        # == -2 * sum(p * clamp(log p, -100)) / (Bp*N), p = perm + eps.
        p = perm_ref[...].astype(jnp.float32) + perm_eps    # (Bp*N, N)
        q = p * jnp.maximum(jnp.log(p), -100.0)
        perm_loss = -2.0 * jnp.sum(q, keepdims=True) / float(perm_rows)

        mu = mu_ref[...].astype(jnp.float32)                # (Bz, D)
        lv = lv_ref[...].astype(jnp.float32)
        t = 1.0 + lv - mu * mu - jnp.exp(lv)
        kld = -0.5 * jnp.sum(t, keepdims=True) / float(kld_batch)

        inv_cnt = 1.0 / cnt_acc[...]
        recon = ce_acc[...] * inv_cnt
        ppl = ppl_acc[...] * inv_cnt

        # Matches the reference PyTorch module exactly: perm_loss is reported
        # but not added; beta multiplies kld.
        total = recon + (alpha + beta) * kld

        total_ref[...] = total
        recon_ref[...] = recon
        permloss_ref[...] = perm_loss
        kld_ref[...] = kld
        ppl_ref[...] = ppl


def critic_forward(msa_true, msa_pred, mask, perm, mu, logvar,
                   *, msa_depth, alpha, beta):
    B, depth, L = msa_true.shape
    assert depth == msa_depth
    C = msa_pred.shape[-1]
    Bp, N, N2 = perm.shape
    Bz, D = mu.shape

    td = _choose_td(depth, L)
    assert depth % td == 0
    nd = depth // td
    grid = (B, nd)

    # Cheap glue only (no M-sized materialization; logits passed unchanged).
    tok = msa_true.astype(jnp.int32)                                   # (B, depth, L)
    weights = jnp.logical_not(mask).astype(jnp.float32).reshape(B, 1, L)
    perm2 = perm.reshape(Bp * N, N2).astype(jnp.float32)
    mu2 = mu.astype(jnp.float32)
    lv2 = logvar.astype(jnp.float32)

    scalar = jax.ShapeDtypeStruct((1, 1), jnp.float32)

    kernel = functools.partial(
        _critic_kernel, alpha=float(alpha), beta=float(beta), perm_eps=1e-07,
        perm_rows=Bp * N, kld_batch=Bz, td=td)

    outs = pl.pallas_call(
        kernel,
        grid=grid,
        in_specs=[
            pl.BlockSpec((1, td, L), lambda b, d: (b, d, 0)),          # tokens
            pl.BlockSpec((1, 1, L), lambda b, d: (b, 0, 0)),           # keep weights
            pl.BlockSpec((1, td, L, C), lambda b, d: (b, d, 0, 0)),    # logits stream
            pl.BlockSpec((Bp * N, N2), lambda b, d: (0, 0)),           # perm (once)
            pl.BlockSpec((Bz, D), lambda b, d: (0, 0)),                # mu (once)
            pl.BlockSpec((Bz, D), lambda b, d: (0, 0)),                # logvar (once)
        ],
        out_specs=[pl.BlockSpec((1, 1), lambda b, d: (0, 0)) for _ in range(5)],
        out_shape=[scalar for _ in range(5)],
        scratch_shapes=[pltpu.VMEM((1, 1), jnp.float32) for _ in range(3)],
        compiler_params=pltpu.CompilerParams(
            dimension_semantics=("arbitrary", "arbitrary"),
            vmem_limit_bytes=32 * 1024 * 1024),
    )(tok, weights, msa_pred, perm2, mu2, lv2)

    total, recon, perm_l, kld, ppl = [o[0, 0] for o in outs]
    return {"loss": total, "recon_loss": recon, "perm_loss": perm_l,
            "kld_loss": kld, "ppl": ppl}


def _reference(msa_true, msa_pred, mask, perm, mu, logvar, alpha, beta):
    logits = msa_pred.astype(jnp.float32)
    lse = jax.nn.logsumexp(logits, axis=-1)
    tgt = jnp.take_along_axis(logits, msa_true[..., None].astype(jnp.int32),
                              axis=-1)[..., 0]
    ce = lse - tgt
    w = jnp.broadcast_to(jnp.logical_not(mask)[:, None, :],
                         msa_true.shape).astype(jnp.float32)
    cnt = w.sum()
    recon = (ce * w).sum() / cnt
    ppl = (jnp.exp(ce) * w).sum() / cnt
    p = perm.astype(jnp.float32) + 1e-07
    q = p * jnp.maximum(jnp.log(p), -100.0)
    perm_loss = -2.0 * q.sum() / (perm.shape[0] * perm.shape[1])
    t = 1.0 + logvar - mu * mu - jnp.exp(logvar)
    kld = -0.5 * t.sum() / mu.shape[0]
    total = recon + (alpha + beta) * kld
    return {"loss": total, "recon_loss": recon, "perm_loss": perm_loss,
            "kld_loss": kld, "ppl": ppl}


if __name__ == "__main__":
    key = jax.random.PRNGKey(0)
    k1, k2, k3, k4, k5, k6 = jax.random.split(key, 6)

    B, depth, L, C = 2, 8, 16, 33   # msa_depth = 8, 33 token classes (fixed by module)
    N = depth                       # soft permutation over MSA depth
    D = 32                          # latent dim
    alpha, beta = 0.1, 0.01         # config.loss.{kld,perm}_loss_scale (synthetic)

    msa_true = jax.random.randint(k1, (B, depth, L), 0, C, dtype=jnp.int32)
    msa_pred = jax.random.normal(k2, (B, depth, L, C), dtype=jnp.float32)
    mask = jax.random.bernoulli(k3, 0.3, (B, L))
    mask = mask.at[:, 0].set(False)  # guarantee at least one selected position
    perm = jax.nn.softmax(jax.random.normal(k4, (B, N, N), dtype=jnp.float32), axis=-1)
    mu = jax.random.normal(k5, (B, D), dtype=jnp.float32)
    logvar = 0.1 * jax.random.normal(k6, (B, D), dtype=jnp.float32)

    out = critic_forward(msa_true, msa_pred, mask, perm, mu, logvar,
                         msa_depth=depth, alpha=alpha, beta=beta)
    out = jax.block_until_ready(out)

    ref = _reference(msa_true, msa_pred, mask, perm, mu, logvar, alpha, beta)
    for name in out:
        v = np.asarray(out[name])
        assert np.isfinite(v), f"non-finite {name}"
        np.testing.assert_allclose(v, np.asarray(ref[name]), rtol=2e-5, atol=2e-5)

    print("KERNEL_OK")
</pallas_src>

<mosaic_0001>
module attributes {stable_mosaic.version = 11 : i64} {
  func.func @_critic_kernel(%arg0: i32, %arg1: i32, %arg2: memref<1x8x16xi32, #tpu.memory_space<vmem>>, %arg3: memref<1x1x16xf32, #tpu.memory_space<vmem>>, %arg4: memref<1x8x16x33xf32, #tpu.memory_space<vmem>>, %arg5: memref<16x8xf32, #tpu.memory_space<vmem>>, %arg6: memref<2x32xf32, #tpu.memory_space<vmem>>, %arg7: memref<2x32xf32, #tpu.memory_space<vmem>>, %arg8: memref<1x1xf32, #tpu.memory_space<vmem>>, %arg9: memref<1x1xf32, #tpu.memory_space<vmem>>, %arg10: memref<1x1xf32, #tpu.memory_space<vmem>>, %arg11: memref<1x1xf32, #tpu.memory_space<vmem>>, %arg12: memref<1x1xf32, #tpu.memory_space<vmem>>, %arg13: memref<1x1xf32, #tpu.memory_space<vmem>>, %arg14: memref<1x1xf32, #tpu.memory_space<vmem>>, %arg15: memref<1x1xf32, #tpu.memory_space<vmem>>) attributes {dimension_semantics = [#tpu.dimension_semantics<arbitrary>, #tpu.dimension_semantics<arbitrary>], iteration_bounds = array<i64: 2, 1>, scalar_prefetch = 0 : i64, scratch_operands = 3 : i64, tpu.core_type = #tpu.core_type<tc>, window_params = [{transform_indices = @transform_0, window_bounds = array<i64: 1, 8, 16>}, {transform_indices = @transform_1, window_bounds = array<i64: 1, 1, 16>}, {transform_indices = @transform_2, window_bounds = array<i64: 1, 8, 16, 33>}, {pipeline_mode = #tpu.pipeline_mode<synchronous>, transform_indices = @transform_3, window_bounds = array<i64: 16, 8>}, {pipeline_mode = #tpu.pipeline_mode<synchronous>, transform_indices = @transform_4, window_bounds = array<i64: 2, 32>}, {pipeline_mode = #tpu.pipeline_mode<synchronous>, transform_indices = @transform_5, window_bounds = array<i64: 2, 32>}, {pipeline_mode = #tpu.pipeline_mode<synchronous>, transform_indices = @transform_6, window_bounds = array<i64: 1, 1>}, {pipeline_mode = #tpu.pipeline_mode<synchronous>, transform_indices = @transform_7, window_bounds = array<i64: 1, 1>}, {pipeline_mode = #tpu.pipeline_mode<synchronous>, transform_indices = @transform_8, window_bounds = array<i64: 1, 1>}, {pipeline_mode = #tpu.pipeline_mode<synchronous>, transform_indices = @transform_9, window_bounds = array<i64: 1, 1>}, {pipeline_mode = #tpu.pipeline_mode<synchronous>, transform_indices = @transform_10, window_bounds = array<i64: 1, 1>}]} {
    %c0_i32 = arith.constant 0 : i32
    %0 = arith.cmpi eq, %arg0, %c0_i32 : i32
    %c0_i32_0 = arith.constant 0 : i32
    %1 = arith.cmpi eq, %arg1, %c0_i32_0 : i32
    %2 = arith.andi %0, %1 : i1
    %c1_i32 = arith.constant 1 : i32
    %3 = arith.cmpi eq, %arg0, %c1_i32 : i32
    %c0_i32_1 = arith.constant 0 : i32
    %4 = arith.cmpi eq, %arg1, %c0_i32_1 : i32
    %5 = arith.andi %3, %4 : i1
    %6 = arith.extui %2 : i1 to i32
    %c0_i32_2 = arith.constant 0 : i32
    %7 = arith.cmpi ne, %6, %c0_i32_2 : i32
    scf.if %7 {
      %cst_34 = arith.constant 0.000000e+00 : f32
      %68 = vector.broadcast %cst_34 : f32 to vector<1x1xf32>
      %c0_35 = arith.constant 0 : index
      %c0_36 = arith.constant 0 : index
      %69 = vector.load %arg13[%c0_35, %c0_36] : memref<1x1xf32, #tpu.memory_space<vmem>>, vector<1x1xf32>
      tpu.vector_store %arg13[%c0_35, %c0_36], %68 {strides = array<i32>} : memref<1x1xf32, #tpu.memory_space<vmem>>, vector<1x1xf32>,
      %cst_37 = arith.constant 0.000000e+00 : f32
      %70 = vector.broadcast %cst_37 : f32 to vector<1x1xf32>
      %c0_38 = arith.constant 0 : index
      %c0_39 = arith.constant 0 : index
      %71 = vector.load %arg14[%c0_38, %c0_39] : memref<1x1xf32, #tpu.memory_space<vmem>>, vector<1x1xf32>
      tpu.vector_store %arg14[%c0_38, %c0_39], %70 {strides = array<i32>} : memref<1x1xf32, #tpu.memory_space<vmem>>, vector<1x1xf32>,
      %cst_40 = arith.constant 0.000000e+00 : f32
      %72 = vector.broadcast %cst_40 : f32 to vector<1x1xf32>
      %c0_41 = arith.constant 0 : index
      %c0_42 = arith.constant 0 : index
      %73 = vector.load %arg15[%c0_41, %c0_42] : memref<1x1xf32, #tpu.memory_space<vmem>>, vector<1x1xf32>
      tpu.vector_store %arg15[%c0_41, %c0_42], %72 {strides = array<i32>} : memref<1x1xf32, #tpu.memory_space<vmem>>, vector<1x1xf32>,
    } else {
    }
    %c0 = arith.constant 0 : index
    %c0_3 = arith.constant 0 : index
    %c0_4 = arith.constant 0 : index
    %c0_5 = arith.constant 0 : index
    %8 = vector.load %arg4[%c0, %c0_3, %c0_4, %c0_5] : memref<1x8x16x33xf32, #tpu.memory_space<vmem>>, vector<1x8x16x33xf32>
    %c0_6 = arith.constant 0 : index
    %c0_7 = arith.constant 0 : index
    %c0_8 = arith.constant 0 : index
    %9 = vector.load %arg2[%c0_6, %c0_7, %c0_8] : memref<1x8x16xi32, #tpu.memory_space<vmem>>, vector<1x8x16xi32>
    %c0_9 = arith.constant 0 : index
    %c0_10 = arith.constant 0 : index
    %c0_11 = arith.constant 0 : index
    %10 = vector.load %arg3[%c0_9, %c0_10, %c0_11] : memref<1x1x16xf32, #tpu.memory_space<vmem>>, vector<1x1x16xf32>
    %11 = vector.shape_cast %10 : vector<1x1x16xf32> to vector<1x1x16x1xf32>
    %cst = arith.constant dense<0xFF800000> : vector<1x8x16xf32>
    %12 = vector.multi_reduction <maximumf>, %8, %cst [3] : vector<1x8x16x33xf32> to vector<1x8x16xf32>
    %13 = vector.shape_cast %12 : vector<1x8x16xf32> to vector<1x8x16x1xf32>
    %14 = vector.broadcast %13 : vector<1x8x16x1xf32> to vector<1x8x16x33xf32>
    %15 = arith.subf %8, %14 : vector<1x8x16x33xf32>
    %16 = math.exp %15 : vector<1x8x16x33xf32>
    %cst_12 = arith.constant dense<0.000000e+00> : vector<1x8x16xf32>
    %17 = vector.multi_reduction <add>, %16, %cst_12 [3] : vector<1x8x16x33xf32> to vector<1x8x16xf32>
    %18 = vector.shape_cast %17 : vector<1x8x16xf32> to vector<1x8x16x1xf32>
    %19 = math.log %18 : vector<1x8x16x1xf32>
    %20 = arith.addf %13, %19 : vector<1x8x16x1xf32>
    %21 = tpu.iota {dimensions = array<i32: 3>} : vector<1x8x16x33xi32>
    %22 = vector.shape_cast %9 : vector<1x8x16xi32> to vector<1x8x16x1xi32>
    %23 = vector.broadcast %22 : vector<1x8x16x1xi32> to vector<1x8x16x33xi32>
    %24 = arith.cmpi eq, %21, %23 : vector<1x8x16x33xi32>
    %cst_13 = arith.constant 0.000000e+00 : f32
    %25 = vector.broadcast %cst_13 : f32 to vector<1x8x16x33xf32>
    %26 = arith.select %24, %8, %25 : vector<1x8x16x33xi1>, vector<1x8x16x33xf32>
    %cst_14 = arith.constant dense<0.000000e+00> : vector<1x8x16xf32>
    %27 = vector.multi_reduction <add>, %26, %cst_14 [3] : vector<1x8x16x33xf32> to vector<1x8x16xf32>
    %28 = vector.shape_cast %27 : vector<1x8x16xf32> to vector<1x8x16x1xf32>
    %29 = arith.subf %20, %28 : vector<1x8x16x1xf32>
    %cst_15 = arith.constant 0.000000e+00 : f32
    %30 = vector.broadcast %cst_15 : f32 to vector<1x1x16x1xf32>
    %31 = arith.cmpf ogt, %11, %30 : vector<1x1x16x1xf32>
    %c0_16 = arith.constant 0 : index
    %c0_17 = arith.constant 0 : index
    %32 = vector.load %arg13[%c0_16, %c0_17] : memref<1x1xf32, #tpu.memory_space<vmem>>, vector<1x1xf32>
    %33 = vector.broadcast %11 : vector<1x1x16x1xf32> to vector<1x8x16x1xf32>
    %34 = arith.mulf %29, %33 : vector<1x8x16x1xf32>
    %35 = vector.shape_cast %34 : vector<1x8x16x1xf32> to vector<1x1x8x16x1xf32>
    %cst_18 = arith.constant dense<0.000000e+00> : vector<1xf32>
    %36 = vector.multi_reduction <add>, %35, %cst_18 [1, 2, 3, 4] : vector<1x1x8x16x1xf32> to vector<1xf32>
    %37 = vector.shape_cast %36 : vector<1xf32> to vector<1x1x1x1x1xf32>
    %38 = vector.extract %37[0, 0, 0, 0, 0] : f32 from vector<1x1x1x1x1xf32>
    %39 = vector.broadcast %38 : f32 to vector<1x1xf32>
    %40 = arith.addf %32, %39 : vector<1x1xf32>
    %c0_19 = arith.constant 0 : index
    %c0_20 = arith.constant 0 : index
    %41 = vector.load %arg13[%c0_19, %c0_20] : memref<1x1xf32, #tpu.memory_space<vmem>>, vector<1x1xf32>
    tpu.vector_store %arg13[%c0_19, %c0_20], %40 {strides = array<i32>} : memref<1x1xf32, #tpu.memory_space<vmem>>, vector<1x1xf32>,
    %c0_21 = arith.constant 0 : index
    %c0_22 = arith.constant 0 : index
    %42 = vector.load %arg14[%c0_21, %c0_22] : memref<1x1xf32, #tpu.memory_space<vmem>>, vector<1x1xf32>
    %cst_23 = arith.constant 0.000000e+00 : f32
    %43 = vector.shape_cast %31 : vector<1x1x16x1xi1> to vector<1x1x16x1xi1>
    %44 = vector.broadcast %43 : vector<1x1x16x1xi1> to vector<1x8x16x1xi1>
    %45 = vector.broadcast %cst_23 : f32 to vector<1x8x16x1xf32>
    %46 = arith.select %44, %29, %45 : vector<1x8x16x1xi1>, vector<1x8x16x1xf32>
    %47 = math.exp %46 : vector<1x8x16x1xf32>
    %48 = vector.broadcast %11 : vector<1x1x16x1xf32> to vector<1x8x16x1xf32>
    %49 = arith.mulf %47, %48 : vector<1x8x16x1xf32>
    %50 = vector.shape_cast %49 : vector<1x8x16x1xf32> to vector<1x1x8x16x1xf32>
    %cst_24 = arith.constant dense<0.000000e+00> : vector<1xf32>
    %51 = vector.multi_reduction <add>, %50, %cst_24 [1, 2, 3, 4] : vector<1x1x8x16x1xf32> to vector<1xf32>
    %52 = vector.shape_cast %51 : vector<1xf32> to vector<1x1x1x1x1xf32>
    %53 = vector.extract %52[0, 0, 0, 0, 0] : f32 from vector<1x1x1x1x1xf32>
    %54 = vector.broadcast %53 : f32 to vector<1x1xf32>
    %55 = arith.addf %42, %54 : vector<1x1xf32>
    %c0_25 = arith.constant 0 : index
    %c0_26 = arith.constant 0 : index
    %56 = vector.load %arg14[%c0_25, %c0_26] : memref<1x1xf32, #tpu.memory_space<vmem>>, vector<1x1xf32>
    tpu.vector_store %arg14[%c0_25, %c0_26], %55 {strides = array<i32>} : memref<1x1xf32, #tpu.memory_space<vmem>>, vector<1x1xf32>,
    %c0_27 = arith.constant 0 : index
    %c0_28 = arith.constant 0 : index
    %57 = vector.load %arg15[%c0_27, %c0_28] : memref<1x1xf32, #tpu.memory_space<vmem>>, vector<1x1xf32>
    %58 = vector.shape_cast %11 : vector<1x1x16x1xf32> to vector<1x1x1x16x1xf32>
    %cst_29 = arith.constant dense<0.000000e+00> : vector<1xf32>
    %59 = vector.multi_reduction <add>, %58, %cst_29 [1, 2, 3, 4] : vector<1x1x1x16x1xf32> to vector<1xf32>
    %60 = vector.shape_cast %59 : vector<1xf32> to vector<1x1x1x1x1xf32>
    %61 = vector.extract %60[0, 0, 0, 0, 0] : f32 from vector<1x1x1x1x1xf32>
    %cst_30 = arith.constant 8.000000e+00 : f32
    %62 = arith.mulf %61, %cst_30 : f32
    %63 = vector.broadcast %62 : f32 to vector<1x1xf32>
    %64 = arith.addf %57, %63 : vector<1x1xf32>
    %c0_31 = arith.constant 0 : index
    %c0_32 = arith.constant 0 : index
    %65 = vector.load %arg15[%c0_31, %c0_32] : memref<1x1xf32, #tpu.memory_space<vmem>>, vector<1x1xf32>
    tpu.vector_store %arg15[%c0_31, %c0_32], %64 {strides = array<i32>} : memref<1x1xf32, #tpu.memory_space<vmem>>, vector<1x1xf32>,
    %66 = arith.extui %5 : i1 to i32
    %c0_i32_33 = arith.constant 0 : i32
    %67 = arith.cmpi ne, %66, %c0_i32_33 : i32
    scf.if %67 {
      %c0_34 = arith.constant 0 : index
      %c0_35 = arith.constant 0 : index
      %68 = vector.load %arg5[%c0_34, %c0_35] : memref<16x8xf32, #tpu.memory_space<vmem>>, vector<16x8xf32>
      %cst_36 = arith.constant 1.000000e-07 : f32
      %69 = vector.broadcast %cst_36 : f32 to vector<16x8xf32>
      %70 = arith.addf %68, %69 : vector<16x8xf32>
      %71 = math.log %70 : vector<16x8xf32>
      %cst_37 = arith.constant -1.000000e+02 : f32
      %72 = vector.broadcast %cst_37 : f32 to vector<16x8xf32>
      %73 = arith.maximumf %71, %72 : vector<16x8xf32>
      %74 = arith.mulf %70, %73 : vector<16x8xf32>
      %75 = vector.shape_cast %74 : vector<16x8xf32> to vector<1x16x8xf32>
      %cst_38 = arith.constant dense<0.000000e+00> : vector<1xf32>
      %76 = vector.multi_reduction <add>, %75, %cst_38 [1, 2] : vector<1x16x8xf32> to vector<1xf32>
      %77 = vector.shape_cast %76 : vector<1xf32> to vector<1x1x1xf32>
      %78 = vector.extract %77[0, 0, 0] : f32 from vector<1x1x1xf32>
      %79 = vector.broadcast %78 : f32 to vector<1x1xf32>
      %cst_39 = arith.constant -2.000000e+00 : f32
      %80 = vector.broadcast %cst_39 : f32 to vector<1x1xf32>
      %81 = arith.mulf %80, %79 : vector<1x1xf32>
      %cst_40 = arith.constant 1.600000e+01 : f32
      %82 = vector.broadcast %cst_40 : f32 to vector<1x1xf32>
      %83 = arith.divf %81, %82 : vector<1x1xf32>
      %c0_41 = arith.constant 0 : index
      %c0_42 = arith.constant 0 : index
      %84 = vector.load %arg6[%c0_41, %c0_42] : memref<2x32xf32, #tpu.memory_space<vmem>>, vector<2x32xf32>
      %c0_43 = arith.constant 0 : index
      %c0_44 = arith.constant 0 : index
      %85 = vector.load %arg7[%c0_43, %c0_44] : memref<2x32xf32, #tpu.memory_space<vmem>>, vector<2x32xf32>
      %cst_45 = arith.constant 1.000000e+00 : f32
      %86 = vector.broadcast %cst_45 : f32 to vector<2x32xf32>
      %87 = arith.addf %86, %85 : vector<2x32xf32>
      %88 = arith.mulf %84, %84 : vector<2x32xf32>
      %89 = arith.subf %87, %88 : vector<2x32xf32>
      %90 = math.exp %85 : vector<2x32xf32>
      %91 = arith.subf %89, %90 : vector<2x32xf32>
      %92 = vector.shape_cast %91 : vector<2x32xf32> to vector<1x2x32xf32>
      %cst_46 = arith.constant dense<0.000000e+00> : vector<1xf32>
      %93 = vector.multi_reduction <add>, %92, %cst_46 [1, 2] : vector<1x2x32xf32> to vector<1xf32>
      %94 = vector.shape_cast %93 : vector<1xf32> to vector<1x1x1xf32>
      %95 = vector.extract %94[0, 0, 0] : f32 from vector<1x1x1xf32>
      %96 = vector.broadcast %95 : f32 to vector<1x1xf32>
      %cst_47 = arith.constant -5.000000e-01 : f32
      %97 = vector.broadcast %cst_47 : f32 to vector<1x1xf32>
      %98 = arith.mulf %97, %96 : vector<1x1xf32>
      %cst_48 = arith.constant 2.000000e+00 : f32
      %99 = vector.broadcast %cst_48 : f32 to vector<1x1xf32>
      %100 = arith.divf %98, %99 : vector<1x1xf32>
      %c0_49 = arith.constant 0 : index
      %c0_50 = arith.constant 0 : index
      %101 = vector.load %arg15[%c0_49, %c0_50] : memref<1x1xf32, #tpu.memory_space<vmem>>, vector<1x1xf32>
      %cst_51 = arith.constant 1.000000e+00 : f32
      %102 = vector.broadcast %cst_51 : f32 to vector<1x1xf32>
      %103 = arith.divf %102, %101 : vector<1x1xf32>
      %c0_52 = arith.constant 0 : index
      %c0_53 = arith.constant 0 : index
      %104 = vector.load %arg13[%c0_52, %c0_53] : memref<1x1xf32, #tpu.memory_space<vmem>>, vector<1x1xf32>
      %105 = arith.mulf %104, %103 : vector<1x1xf32>
      %c0_54 = arith.constant 0 : index
      %c0_55 = arith.constant 0 : index
      %106 = vector.load %arg14[%c0_54, %c0_55] : memref<1x1xf32, #tpu.memory_space<vmem>>, vector<1x1xf32>
      %107 = arith.mulf %106, %103 : vector<1x1xf32>
      %cst_56 = arith.constant 1.100000e-01 : f32
      %108 = vector.broadcast %cst_56 : f32 to vector<1x1xf32>
      %109 = arith.mulf %108, %100 : vector<1x1xf32>
      %110 = arith.addf %105, %109 : vector<1x1xf32>
      %c0_57 = arith.constant 0 : index
      %c0_58 = arith.constant 0 : index
      %111 = vector.load %arg8[%c0_57, %c0_58] : memref<1x1xf32, #tpu.memory_space<vmem>>, vector<1x1xf32>
      tpu.vector_store %arg8[%c0_57, %c0_58], %110 {strides = array<i32>} : memref<1x1xf32, #tpu.memory_space<vmem>>, vector<1x1xf32>,
      %c0_59 = arith.constant 0 : index
      %c0_60 = arith.constant 0 : index
      %112 = vector.load %arg9[%c0_59, %c0_60] : memref<1x1xf32, #tpu.memory_space<vmem>>, vector<1x1xf32>
      tpu.vector_store %arg9[%c0_59, %c0_60], %105 {strides = array<i32>} : memref<1x1xf32, #tpu.memory_space<vmem>>, vector<1x1xf32>,
      %c0_61 = arith.constant 0 : index
      %c0_62 = arith.constant 0 : index
      %113 = vector.load %arg10[%c0_61, %c0_62] : memref<1x1xf32, #tpu.memory_space<vmem>>, vector<1x1xf32>
      tpu.vector_store %arg10[%c0_61, %c0_62], %83 {strides = array<i32>} : memref<1x1xf32, #tpu.memory_space<vmem>>, vector<1x1xf32>,
      %c0_63 = arith.constant 0 : index
      %c0_64 = arith.constant 0 : index
      %114 = vector.load %arg11[%c0_63, %c0_64] : memref<1x1xf32, #tpu.memory_space<vmem>>, vector<1x1xf32>
      tpu.vector_store %arg11[%c0_63, %c0_64], %100 {strides = array<i32>} : memref<1x1xf32, #tpu.memory_space<vmem>>, vector<1x1xf32>,
      %c0_65 = arith.constant 0 : index
      %c0_66 = arith.constant 0 : index
      %115 = vector.load %arg12[%c0_65, %c0_66] : memref<1x1xf32, #tpu.memory_space<vmem>>, vector<1x1xf32>
      tpu.vector_store %arg12[%c0_65, %c0_66], %107 {strides = array<i32>} : memref<1x1xf32, #tpu.memory_space<vmem>>, vector<1x1xf32>,
    } else {
    }
    return
  }
  func.func @transform_0(%arg0: i32, %arg1: i32) -> (i32, i32, i32) {
    %c0_i32 = arith.constant 0 : i32
    %c0_i32_0 = arith.constant 0 : i32
    return %arg0, %arg1, %c0_i32 : i32, i32, i32
  }
  func.func @transform_1(%arg0: i32, %arg1: i32) -> (i32, i32, i32) {
    %c0_i32 = arith.constant 0 : i32
    %c0_i32_0 = arith.constant 0 : i32
    %c0_i32_1 = arith.constant 0 : i32
    return %arg0, %c0_i32, %c0_i32_0 : i32, i32, i32
  }
  func.func @transform_2(%arg0: i32, %arg1: i32) -> (i32, i32, i32, i32) {
    %c0_i32 = arith.constant 0 : i32
    %c0_i32_0 = arith.constant 0 : i32
    %c0_i32_1 = arith.constant 0 : i32
    return %arg0, %arg1, %c0_i32, %c0_i32_0 : i32, i32, i32, i32
  }
  func.func @transform_3(%arg0: i32, %arg1: i32) -> (i32, i32) {
    %c0_i32 = arith.constant 0 : i32
    %c0_i32_0 = arith.constant 0 : i32
    %c0_i32_1 = arith.constant 0 : i32
    return %c0_i32, %c0_i32_0 : i32, i32
  }
  func.func @transform_4(%arg0: i32, %arg1: i32) -> (i32, i32) {
    %c0_i32 = arith.constant 0 : i32
    %c0_i32_0 = arith.constant 0 : i32
    %c0_i32_1 = arith.constant 0 : i32
    return %c0_i32, %c0_i32_0 : i32, i32
  }
  func.func @transform_5(%arg0: i32, %arg1: i32) -> (i32, i32) {
    %c0_i32 = arith.constant 0 : i32
    %c0_i32_0 = arith.constant 0 : i32
    %c0_i32_1 = arith.constant 0 : i32
    return %c0_i32, %c0_i32_0 : i32, i32
  }
  func.func @transform_6(%arg0: i32, %arg1: i32) -> (i32, i32) {
    %c0_i32 = arith.constant 0 : i32
    %c0_i32_0 = arith.constant 0 : i32
    %c0_i32_1 = arith.constant 0 : i32
    return %c0_i32, %c0_i32_0 : i32, i32
  }
  func.func @transform_7(%arg0: i32, %arg1: i32) -> (i32, i32) {
    %c0_i32 = arith.constant 0 : i32
    %c0_i32_0 = arith.constant 0 : i32
    %c0_i32_1 = arith.constant 0 : i32
    return %c0_i32, %c0_i32_0 : i32, i32
  }
  func.func @transform_8(%arg0: i32, %arg1: i32) -> (i32, i32) {
    %c0_i32 = arith.constant 0 : i32
    %c0_i32_0 = arith.constant 0 : i32
    %c0_i32_1 = arith.constant 0 : i32
    return %c0_i32, %c0_i32_0 : i32, i32
  }
  func.func @transform_9(%arg0: i32, %arg1: i32) -> (i32, i32) {
    %c0_i32 = arith.constant 0 : i32
    %c0_i32_0 = arith.constant 0 : i32
    %c0_i32_1 = arith.constant 0 : i32
    return %c0_i32, %c0_i32_0 : i32, i32
  }
  func.func @transform_10(%arg0: i32, %arg1: i32) -> (i32, i32) {
    %c0_i32 = arith.constant 0 : i32
    %c0_i32_0 = arith.constant 0 : i32
    %c0_i32_1 = arith.constant 0 : i32
    return %c0_i32, %c0_i32_0 : i32, i32
  }
}

</mosaic_0001>

<bundles_post_ra>
// kernel: tpu_custom_call.1
= control target key start
LH: loop header
LB: loop body
LE: loop exit
PB: predicated region body
PF: predicated region fallthrough
CT: control target
= control target key end

     0   :  { %16 = vsyncpa [#allocation6], 0  ;;  %s2330_s0 = inlined_call_operand.vmem [shape: s32[2,8,16], index: 0, kind: input, shape index: {}]   ;;  %s2331_s1 = inlined_call_operand.vmem [shape: f32[2,1,16], index: 1, kind: input, shape index: {}]   ;;  %s2332_s2 = inlined_call_operand.hbm [shape: f32[2,8,16,33], index: 2, kind: input, shape index: {}]   ;;  %s2333_s3 = inlined_call_operand.vmem [shape: f32[16,8], index: 3, kind: input, shape index: {}]   ;;  %s2334_s4 = inlined_call_operand.vmem [shape: f32[2,32], index: 4, kind: input, shape index: {}]   ;;  %s2335_s5 = inlined_call_operand.vmem [shape: f32[2,32], index: 5, kind: input, shape index: {}]   ;;  %s2336_s6 = inlined_call_operand.hbm [shape: f32[1,1], index: 6, kind: output, shape index: {0}]   ;;  %s2337_s7 = inlined_call_operand.hbm [shape: f32[1,1], index: 7, kind: output, shape index: {1}]   ;;  %s2338_s8 = inlined_call_operand.hbm [shape: f32[1,1], index: 8, kind: output, shape index: {2}]   ;;  %s2339_s9 = inlined_call_operand.hbm [shape: f32[1,1], index: 9, kind: output, shape index: {3}]   ;;  %s2340_s10 = inlined_call_operand.hbm [shape: f32[1,1], index: 10, kind: output, shape index: {4}]  }
   0x1   :  { %18 = vsyncpa [#allocation6 + $0x1], 0 }
   0x2   :  { %19 = vsyncpa [#allocation7], 0 }
   0x3   :  { %20 = vsyncpa [#allocation10], 0 }
   0x4   :  { %21 = vsyncpa [#allocation13], 0  ;;  %s1788_s13 = smov 0   ;;  %s1790_s14 = smov 0  }
   0x5   :  { %s1792_s15 = smov 0   ;;  %s1794_s16 = smov 0  }
   0x6   :  { %s1796_s17 = smov 0   ;;  %s1798_s18 = smov 0  }
   0x7 LB: > { %2344 = sst [smem:[#allocation19_spill]] %s1718_s17  ;;  %s2341_s19 = sadd.s32 4294967295, %s1722_s18   ;;  %s1722_s18 = sphi %s1798_s18, %s27_s18   ;;  %s1718_s17 = sphi %s1796_s17, %s2352_s17   ;;  %s1714_s16 = sphi %s1794_s16, %s2351_s16   ;;  %s1710_s15 = sphi %s1792_s15, %s2355_s15   ;;  %s1706_s14 = sphi %s1790_s14, %s2354_s14   ;;  %s1702_s13 = sphi %s1788_s13, %s2353_s13  }
   0x8   : > { %s39_s20 = sadd.s32 1, %s1718_s17  ;;  %s102_s21 = sadd.s32 1, %s1710_s15 }
   0x9   : > { %p41_p0 = scmp.ge.s32.totalorder %s39_s20, 2  ;;  %p109_p1 = scmp.ne.s32.totalorder %s1710_s15, %s1706_s14 }
   0xa   : > { %p110_p2 = scmp.eq.s32.totalorder %s1722_s18, 0  ;;  %p115_p4 = scmp.ne.s32.totalorder %s1706_s14, %s1702_s13 }
   0xb   : > { %s2357_s20 = smov (%p41_p0, %s39_s20), 0  ;;  %p116_p5 = scmp.eq.s32.totalorder %s2341_s19, 0 }
   0xc   : > { %2345 = sst [smem:[#allocation20_spill]] %s2357_s20  ;;  %p1824_p3 = por %p110_p2, %p109_p1 }
   0xd   : > { %s97_s23 = ssub.s32 %s1718_s17, %s2357_s20  ;;  %p1833_p7 = por %p116_p5, %p115_p4 }
   0xe   : > { %p100_p6 = scmp.eq.s32.totalorder %s97_s23, 0  ;;  %p1341_p8 = scmp.lt.s32.totalorder %s1722_s18, 2 }
   0xf   : > { %s332_s26 = sand.u32 1, %s1710_s15   ;;  %s1302_s27 = sshll.u32 %s1718_s17, 11 }
  0x10   : > { %s1839_s25 = scalar_select %p100_p6, %s1710_s15, %s102_s21  }
  0x11   : > { %s1281_s28 = sshll.u32 %s332_s26, 7  ;;  %s345_s11 = scalar_lea.hbm %s2332_s2, %s1302_s27 }
  0x12   : > { %s336_s12 = scalar_lea.vmem [#allocation5], %s1281_s28  ;;  %p1848_p9 = pnand %p1341_p8, %p1824_p3 }
  0x13   : > { %s346_s13 = sshll.u32 %s336_s12, 4  ;;  %s333_s23 = scalar_lea.sflag [#allocation6], %s332_s26  ;;  %s347_s13 = int_to_ptr.vmem [resolvable:$true] %s346_s13 }
  0x14   : > { %p1514_p10 = pneg %p1848_p9  ;;  %s1525_s21 = scalar_lea.vmem %s347_s13, 2048 }
  0x15   : > { %p1526_p11 = scmp.ne.s32.totalorder %s347_s13, %s1525_s21  ;;  %s1724_s20 = smov [#allocation5]  }
  0x16   : > { %s1530_s17 = sshll.u32 %s1724_s20, 4  ;;  %s1531_s17 = int_to_ptr.vmem [resolvable:$false] %s1530_s17 }
  0x17   : > { %p1528_p12 = pnand %p1526_p11, %p1514_p10  ;;  %s1532_s27 = scalar_lea.vmem %s1531_s17, 4096 }
  0x18   : > { %p1533_p0 = scmp.lt.s32.totalorder %s347_s13, %s1531_s17  ;;  %p1534_p1 = scmp.lt.s32.totalorder %s1532_s27, %s1525_s21 }
  0x19   : > { %p1529_p13 = pneg %p1528_p12 }
  0x1a   : > { %p1535_p2 = por %p1534_p1, %p1533_p0 }
  0x1c   : > { %p1536_p3 = pnand %p1535_p2, %p1529_p13 }
  0x1e   : > { %1539 = shalt.err (!%p1536_p3)
}
  0x1f   : > { %s1725_s22 = smov 128   ;;  %s1726_s26 = smov 8  }
  0x20   : > { %1340 = dma.hbm_to_vmem [thread:$0]  (!%p1848_p9), %s345_s11, 2048, %s347_s13, %s333_s23, %s1725_s22, %s1725_s22, %s1726_s26  }
  0x21   : > { %p1284_p4 = scmp.ge.s32.totalorder %s1722_s18, 1  ;;  %p354_p5 = scmp.lt.s32.totalorder %s1722_s18, 3 }
  0x23   : > { %p355_p6 = pnand %p1284_p4, %p354_p5 }
  0x24   : > { %s360_s20 = sand.u32 (!%p355_p6), 1, %s1706_s14  }
  0x25   : > { %358 = sbr.rel (%p355_p6) target bundleno = 807 (0x327), region = 44  ;;  %s1285_s28 = sshll.u32 (!%p355_p6), %s360_s20, 7 }
  0x26   : > { %s361_s17 = scalar_lea.sflag (!%p355_p6), [#allocation6], %s360_s20  ;;  %s1859_s29 = scalar_lea.vmem (!%p355_p6), [#allocation5], %s1285_s28 }
  0x2a   : > { %1685 = dma.done.wait (%p1833_p7), %s361_s17, 2048  }
  0x2b   : > { %1687 = vsyncadd (%p1833_p7), %s361_s17, 4294965248  ;;  %p406_p8 = scmp.lt.s32.totalorder %s1714_s16, 1  ;;  %p417_p9 = scmp.eq.s32.totalorder %s1714_s16, 0 }
  0x2c   : > { %p421_p10 = scmp.eq.s32.totalorder %s1714_s16, 1  ;;  %vm426_vm0 = vcmask (%p417_p9), 0   ;;  %v1727_v0 = vmov (%p417_p9), 0.0  }
  0x2d   : > { %s1869_s19 = scalar_select %p406_p8, %s1714_s16, 1  ;;  %427 = vst.msk [vmem:[#allocation2] sm:$0x1] (%p417_p9), %vm426_vm0, %v1727_v0  ;;  %428 = vst.msk [vmem:[#allocation3] sm:$0x1] (%p417_p9), %vm426_vm0, %v1727_v0 }
  0x2e   : > { %425 = sbr.rel (!%p417_p9) target bundleno = 51 (0x33), region = 52  ;;  %429 = vst.msk [vmem:[#allocation4] sm:$0x1] (%p417_p9), %vm426_vm0, %v1727_v0 }
  0x2f   : > { %s1286_s30 = sshll.u32 %s1869_s19, 3  ;;  %s415_s13 = scalar_lea.vmem %s2331_s1, %s1869_s19 }
  0x30   : > { %s1879_s24 = scalar_lea.vmem %s2330_s0, %s1286_s30 }
  0x33 PF: > { %v1882_v1 = vld [vmem:[%s1859_s29 + $0x10] sm:$0xff]  ;;  %vm459_vm1 = vcmask 269312   ;;  %v1885_v2 = vld [vmem:[%s1859_s29 + $0x18] sm:$0xff]  ;;  %v1890_v4 = vld [vmem:[%s1859_s29] sm:$0xff]  ;;  %v652_v33 = vlaneseq }
  0x34   : > { %v466_v3 = vsel %vm459_vm1, %v1882_v1, -inf  ;;  %v1893_v5 = vld [vmem:[%s1859_s29 + $0x8] sm:$0xff]  ;;  %v460_v6 = vsel %vm459_vm1, %v1890_v4, -inf  ;;  %v469_v7 = vsel %vm459_vm1, %v1885_v2, -inf  ;;  %v1905_v10 = vld [vmem:[%s1859_s29 + $0x20] sm:$0xff]  ;;  %v1910_v12 = vld [vmem:[%s1859_s29 + $0x38] sm:$0xff] }
  0x35   : > { %467 = vmax.xlane.f32.xlu1 %v466_v3  ;;  %461 = vmax.xlane.f32.xlu0 %v460_v6  ;;  %v1900_v8 = vld [vmem:[%s1859_s29 + $0x28] sm:$0xff]  ;;  %v463_v9 = vsel %vm459_vm1, %v1893_v5, -inf  ;;  %v472_v13 = vsel %vm459_vm1, %v1905_v10, -inf  ;;  %v1915_v14 = vld [vmem:[%s1859_s29 + $0x30] sm:$0xff]  ;;  %v481_v15 = vsel %vm459_vm1, %v1910_v12, -inf  ;;  %v1925_v18 = vld [vmem:[%s1859_s29 + $0x40] sm:$0xff] }
  0x36   : > { %v475_v11 = vsel %vm459_vm1, %v1900_v8, -inf  ;;  %v1920_v16 = vld [vmem:[%s1859_s29 + $0x48] sm:$0xff]  ;;  %v478_v17 = vsel %vm459_vm1, %v1915_v14, -inf  ;;  %v1930_v20 = vld [vmem:[%s1859_s29 + $0x58] sm:$0xff]  ;;  %v484_v21 = vsel %vm459_vm1, %v1925_v18, -inf  ;;  %v1935_v22 = vld [vmem:[%s1859_s29 + $0x50] sm:$0xff] }
  0x37   : > { %v487_v19 = vsel %vm459_vm1, %v1920_v16, -inf  ;;  %v493_v23 = vsel %vm459_vm1, %v1930_v20, -inf  ;;  %v1940_v24 = vld [vmem:[%s1859_s29 + $0x68] sm:$0xff]  ;;  %v490_v25 = vsel %vm459_vm1, %v1935_v22, -inf  ;;  %v1945_v26 = vld [vmem:[%s1859_s29 + $0x60] sm:$0xff]  ;;  %v1950_v28 = vld [vmem:[%s1859_s29 + $0x78] sm:$0xff] }
  0x38   : > { %v499_v27 = vsel %vm459_vm1, %v1940_v24, -inf  ;;  %v496_v29 = vsel %vm459_vm1, %v1945_v26, -inf  ;;  %v1955_v30 = vld [vmem:[%s1859_s29 + $0x70] sm:$0xff]  ;;  %v505_v31 = vsel %vm459_vm1, %v1950_v28, -inf  ;;  %v655_v34 = vshrl.u32 %v652_v33, 7  ;;  %v446_v36 = vld [vmem:[%s1879_s24] sm:$0xff] }
  0x39   : > { %470 = vmax.xlane.f32.xlu1 %v469_v7  ;;  %464 = vmax.xlane.f32.xlu0 %v463_v9  ;;  %v502_v32 = vsel %vm459_vm1, %v1955_v30, -inf  ;;  %v1992_v7 = vand.u32 127, %v652_v33 }
  0x3a   : > { %v656_v35 = vsub.s32 0, %v655_v34  ;;  %v667_v38 = vsub.s32 1, %v655_v34  ;;  %v678_v40 = vsub.s32 2, %v655_v34  ;;  %v689_v42 = vsub.s32 3, %v655_v34 }
  0x3b   : > { %v700_v43 = vsub.s32 4, %v655_v34  ;;  %v711_v46 = vsub.s32 5, %v655_v34  ;;  %v722_v48 = vsub.s32 6, %v655_v34  ;;  %v733_v50 = vsub.s32 7, %v655_v34 }
  0x3c   : > { %v657_v37 = vrot.slane %v446_v36, %v656_v35  ;;  %v668_v39 = vrot.slane %v446_v36, %v667_v38  ;;  %v679_v41 = vrot.slane %v446_v36, %v678_v40  ;;  %v690_v44 = vrot.slane %v446_v36, %v689_v42 }
  0x3d   : > { %476 = vmax.xlane.f32.xlu1 %v475_v11  ;;  %473 = vmax.xlane.f32.xlu0 %v472_v13  ;;  %v701_v45 = vrot.slane %v446_v36, %v700_v43  ;;  %v712_v47 = vrot.slane %v446_v36, %v711_v46  ;;  %v723_v49 = vrot.slane %v446_v36, %v722_v48 }
  0x3e   : > { %v734_v51 = vrot.slane %v446_v36, %v733_v50 }
  0x41   : > { %482 = vmax.xlane.f32.xlu1 %v481_v15  ;;  %479 = vmax.xlane.f32.xlu0 %v478_v17 }
  0x45   : > { %488 = vmax.xlane.f32.xlu1 %v487_v19  ;;  %485 = vmax.xlane.f32.xlu0 %v484_v21 }
  0x49   : > { %494 = vmax.xlane.f32.xlu1 %v493_v23  ;;  %491 = vmax.xlane.f32.xlu0 %v490_v25 }
  0x4d   : > { %500 = vmax.xlane.f32.xlu1 %v499_v27  ;;  %497 = vmax.xlane.f32.xlu0 %v496_v29 }
  0x51   : > { %506 = vmax.xlane.f32.xlu1 %v505_v31  ;;  %503 = vmax.xlane.f32.xlu0 %v502_v32 }
  0x62   : > { %663 = vbcast.lane.b32.xlu1 %v657_v37, 264 }
  0x66   : > { %670 = vbcast.lane.b32.xlu1 %v668_v39, 256 }
  0x67   : > { %659 = vbcast.lane.b32.xlu0 %v657_v37, 256 }
  0x6a   : > { %674 = vbcast.lane.b32.xlu1 %v668_v39, 264 }
  0x6b   : > { %681 = vbcast.lane.b32.xlu0 %v679_v41, 256 }
  0x6e   : > { %685 = vbcast.lane.b32.xlu1 %v679_v41, 264 }
  0x6f   : > { %692 = vbcast.lane.b32.xlu0 %v690_v44, 256 }
  0x72   : > { %696 = vbcast.lane.b32.xlu1 %v690_v44, 264 }
  0x73   : > { %703 = vbcast.lane.b32.xlu0 %v701_v45, 256 }
  0x76   : > { %707 = vbcast.lane.b32.xlu1 %v701_v45, 264 }
  0x77   : > { %714 = vbcast.lane.b32.xlu0 %v712_v47, 256 }
  0x7a   : > { %718 = vbcast.lane.b32.xlu1 %v712_v47, 264 }
  0x7b   : > { %725 = vbcast.lane.b32.xlu0 %v723_v49, 256 }
  0x7e   : > { %729 = vbcast.lane.b32.xlu1 %v723_v49, 264 }
  0x7f   : > { %736 = vbcast.lane.b32.xlu0 %v734_v51, 256 }
  0x82   : > { %740 = vbcast.lane.b32.xlu1 %v734_v51, 264 }
  0xbe   : > { %v1962_v52 = vpop.xlane.xlu1 %467  ;;  %v1964_v53 = vpop.xlane.xlu0 %461 }
  0xbf   : > { %v508_v17 = vsub.f32 %v1890_v4, %v1964_v53  ;;  %v510_v32 = vsub.f32 %v1882_v1, %v1962_v52 }
  0xc1   : > { %v528_v38 = vmul.f32 1.442695, %v510_v32 }
  0xc2   : > { %v1966_v54 = vpop.xlane.xlu1 %470  ;;  %v1968_v55 = vpop.xlane.xlu0 %464 }
  0xc3   : > { %v509_v11 = vsub.f32 %v1893_v5, %v1968_v55  ;;  %v511_v39 = vsub.f32 %v1885_v2, %v1966_v54 }
  0xc5   : > { %v526_v19 = vmul.f32 1.442695, %v509_v11  ;;  %v530_v46 = vmul.f32 1.442695, %v511_v39 }
  0xc6   : > { %v1970_v56 = vpop.xlane.xlu1 %476  ;;  %v1972_v57 = vpop.xlane.xlu0 %473 }
  0xc7   : > { %v513_v23 = vsub.f32 %v1900_v8, %v1970_v56  ;;  %1408 = vpow2.f32 %v526_v19  ;;  %v512_v47 = vsub.f32 %v1905_v10, %v1972_v57 }
  0xc9   : > { %v534_v35 = vmul.f32 1.442695, %v513_v23  ;;  %v532_v11 = vmul.f32 1.442695, %v512_v47 }
  0xca   : > { %v1974_v58 = vpop.xlane.xlu1 %482  ;;  %v1976_v59 = vpop.xlane.xlu0 %479 }
  0xcb   : > { %v515_v36 = vsub.f32 %v1910_v12, %v1974_v58 }
  0xcd   : > { %v538_v42 = vmul.f32 1.442695, %v515_v36 }
  0xce   : > { %v1978_v60 = vpop.xlane.xlu1 %488  ;;  %v1980_v61 = vpop.xlane.xlu0 %485 }
  0xd2   : > { %v1982_v62 = vpop.xlane.xlu1 %494  ;;  %v1984_v63 = vpop.xlane.xlu0 %491 }
  0xd6   : > { %v1986_v0 = vpop.xlane.xlu1 %500  ;;  %v1988_v3 = vpop.xlane.xlu0 %497 }
  0xda   : > { %v1990_v6 = vpop.xlane.xlu1 %506  ;;  %v1994_v9 = vpop.xlane.xlu0 %503 }
  0xde   : > { %v664_v13 = vpop.permute.xlu1 %663  ;;  %v660_v15 = vpop.permute.xlu0 %659 }
  0xdf   : > { %vm743_vm2 = vcmp.eq.s32.totalorder %v1992_v7, %v664_v13  ;;  %vm742_vm3 = vcmp.eq.s32.totalorder %v1992_v7, %v660_v15 }
  0xe0   : > { %v759_v21 = vsel %vm743_vm2, %v1893_v5, 0.0  ;;  %v758_v27 = vsel %vm742_vm3, %v1890_v4, 0.0  ;;  %v524_v5 = vmul.f32 1.442695, %v508_v17  ;;  %v1409_v17 = vpop.eup %1408 }
  0xe1   : > { %v777_v25 = vsel %vm459_vm1, %v759_v21, 0.0  ;;  %v774_v31 = vsel %vm459_vm1, %v758_v27, 0.0  ;;  %v520_v21 = vsub.f32 %v1945_v26, %v1988_v3  ;;  %v559_v32 = vsel %vm459_vm1, %v1409_v17, 0.0 }
  0xe2   : > { %v671_v29 = vpop.permute.xlu1 %670  ;;  %778 = vadd.xlane.f32.xlu0 %v777_v25  ;;  %v682_v33 = vpop.permute.xlu0 %681  ;;  %775 = vadd.xlane.f32.xlu1 %v774_v31  ;;  %1410 = vpow2.f32 %v524_v5 }
  0xe3   : > { %vm744_vm4 = vcmp.eq.s32.totalorder %v1992_v7, %v671_v29  ;;  %vm746_vm5 = vcmp.eq.s32.totalorder %v1992_v7, %v682_v33  ;;  %1412 = vpow2.f32 %v534_v35  ;;  %v548_v31 = vmul.f32 1.442695, %v520_v21 }
  0xe4   : > { %v760_v34 = vsel %vm744_vm4, %v1882_v1, 0.0  ;;  %v517_v1 = vsub.f32 %v1920_v16, %v1978_v60  ;;  %v762_v41 = vsel %vm746_vm5, %v1905_v10, 0.0  ;;  %1414 = vpow2.f32 %v528_v38 }
  0xe5   : > { %v780_v4 = vsel %vm459_vm1, %v760_v34, 0.0  ;;  %v786_v48 = vsel %vm459_vm1, %v762_v41, 0.0  ;;  %1416 = vpow2.f32 %v538_v42  ;;  %v514_v10 = vsub.f32 %v1915_v14, %v1976_v59 }
  0xe6   : > { %v675_v37 = vpop.permute.xlu1 %674  ;;  %781 = vadd.xlane.f32.xlu0 %v780_v4  ;;  %v693_v45 = vpop.permute.xlu0 %692  ;;  %v542_v49 = vmul.f32 1.442695, %v517_v1  ;;  %1418 = vpow2.f32 %v530_v46  ;;  %v518_v34 = vsub.f32 %v1935_v22, %v1984_v63  ;;  %vm857_vm4 = vcmask 7168  }
  0xe7   : > { %vm745_vm6 = vcmp.eq.s32.totalorder %v1992_v7, %v675_v37  ;;  %vm748_vm8 = vcmp.eq.s32.totalorder %v1992_v7, %v693_v45  ;;  %v536_v27 = vmul.f32 1.442695, %v514_v10  ;;  %v522_v37 = vsub.f32 %v1955_v30, %v1994_v9 }
  0xe8   : > { %v761_v40 = vsel %vm745_vm6, %v1885_v2, 0.0  ;;  %v519_v2 = vsub.f32 %v1930_v20, %v1982_v62  ;;  %1420 = vpow2.f32 %v542_v49  ;;  %v764_v15 = vsel %vm748_vm8, %v1915_v14, 0.0 }
  0xe9   : > { %v783_v43 = vsel %vm459_vm1, %v761_v40, 0.0  ;;  %v792_v25 = vsel %vm459_vm1, %v764_v15, 0.0  ;;  %1422 = vpow2.f32 %v532_v11  ;;  %v521_v14 = vsub.f32 %v1940_v24, %v1986_v0 }
  0xea   : > { %v686_v44 = vpop.permute.xlu1 %685  ;;  %784 = vadd.xlane.f32.xlu0 %v783_v43  ;;  %v546_v19 = vmul.f32 1.442695, %v519_v2  ;;  %v544_v40 = vmul.f32 1.442695, %v518_v34  ;;  %v523_v43 = vsub.f32 %v1950_v28, %v1990_v6  ;;  %vm900_vm5 = vcmask 0  }
  0xeb   : > { %vm747_vm7 = vcmp.eq.s32.totalorder %v1992_v7, %v686_v44  ;;  %v550_v4 = vmul.f32 1.442695, %v521_v14  ;;  %v552_v44 = vmul.f32 1.442695, %v522_v37  ;;  %vm1045_vm6 = vcmask (%p421_p10), 64512  }
  0xec   : > { %v763_v51 = vsel %vm747_vm7, %v1900_v8, 0.0  ;;  %1424 = vpow2.f32 %v546_v19  ;;  %v554_v47 = vmul.f32 1.442695, %v523_v43  ;;  %vm1070_vm7 = vcmask (%p421_p10), 254976  }
  0xed   : > { %v789_v8 = vsel %vm459_vm1, %v763_v51, 0.0  ;;  %1426 = vpow2.f32 %v536_v27 }
  0xee   : > { %v697_v50 = vpop.permute.xlu1 %696  ;;  %787 = vadd.xlane.f32.xlu0 %v786_v48  ;;  %1428 = vpow2.f32 %v548_v31  ;;  %v1289_v31 = vld [vmem:[%s415_s13] ss:$0 sm:$0xff] }
  0xef   : > { %vm749_vm9 = vcmp.eq.s32.totalorder %v1992_v7, %v697_v50  ;;  %v1411_v29 = vpop.eup %1410 }
  0xf0   : > { %v765_v13 = vsel %vm749_vm9, %v1910_v12, 0.0  ;;  %v516_v12 = vsub.f32 %v1925_v18, %v1980_v61  ;;  %v1413_v33 = vpop.eup %1412  ;;  %v556_v35 = vsel %vm459_vm1, %v1411_v29, 0.0 }
  0xf1   : > { %v795_v23 = vsel %vm459_vm1, %v765_v13, 0.0  ;;  %v1415_v36 = vpop.eup %1414  ;;  %v571_v38 = vsel %vm459_vm1, %v1413_v33, 0.0 }
  0xf2   : > { %796 = vadd.xlane.f32.xlu1 %v795_v23  ;;  %790 = vadd.xlane.f32.xlu0 %v789_v8  ;;  %v540_v5 = vmul.f32 1.442695, %v516_v12  ;;  %v1417_v39 = vpop.eup %1416  ;;  %v562_v41 = vsel %vm459_vm1, %v1415_v36, 0.0  ;;  %v708_v33 = vpop.permute.xlu1 %707 }
  0xf3   : > { %v1419_v1 = vpop.eup %1418  ;;  %v577_v45 = vsel %vm459_vm1, %v1417_v39, 0.0  ;;  %vm751_vm10 = vcmp.eq.s32.totalorder %v1992_v7, %v708_v33 }
  0xf4   : > { %1430 = vpow2.f32 %v540_v5  ;;  %v565_v49 = vsel %vm459_vm1, %v1419_v1, 0.0  ;;  %v767_v36 = vsel %vm751_vm10, %v1920_v16, 0.0 }
  0xf5   : > { %v1421_v42 = vpop.eup %1420  ;;  %1432 = vpow2.f32 %v550_v4  ;;  %v801_v4 = vsel %vm459_vm1, %v767_v36, 0.0 }
  0xf6   : > { %560 = vadd.xlane.f32.xlu1 %v559_v32  ;;  %793 = vadd.xlane.f32.xlu0 %v792_v25  ;;  %1434 = vpow2.f32 %v544_v40  ;;  %v1423_v46 = vpop.eup %1422  ;;  %v583_v48 = vsel %vm459_vm1, %v1421_v42, 0.0  ;;  %v704_v32 = vpop.permute.xlu0 %703 }
  0xf7   : > { %1436 = vpow2.f32 %v552_v44  ;;  %v568_v11 = vsel %vm459_vm1, %v1423_v46, 0.0  ;;  %v719_v34 = vpop.permute.xlu1 %718  ;;  %vm750_vm11 = vcmp.eq.s32.totalorder %v1992_v7, %v704_v32 }
  0xf8   : > { %1438 = vpow2.f32 %v554_v47  ;;  %vm753_vm13 = vcmp.eq.s32.totalorder %v1992_v7, %v719_v34 }
  0xf9   : > { %v1425_v2 = vpop.eup %1424 }
  0xfa   : > { %572 = vadd.xlane.f32.xlu1 %v571_v38  ;;  %557 = vadd.xlane.f32.xlu0 %v556_v35  ;;  %v1427_v50 = vpop.eup %1426  ;;  %v589_v51 = vsel %vm459_vm1, %v1425_v2, 0.0  ;;  %v715_v5 = vpop.permute.xlu0 %714  ;;  %v766_v38 = vsel %vm750_vm11, %v1925_v18, 0.0 }
  0xfb   : > { %v1429_v10 = vpop.eup %1428  ;;  %v574_v17 = vsel %vm459_vm1, %v1427_v50, 0.0  ;;  %vm752_vm12 = vcmp.eq.s32.totalorder %v1992_v7, %v715_v5  ;;  %v730_v37 = vpop.permute.xlu1 %729  ;;  %v798_v40 = vsel %vm459_vm1, %v766_v38, 0.0 }
  0xfc   : > { %v592_v15 = vsel %vm459_vm1, %v1429_v10, 0.0  ;;  %v768_v39 = vsel %vm752_vm12, %v1935_v22, 0.0  ;;  %vm755_vm15 = vcmp.eq.s32.totalorder %v1992_v7, %v730_v37 }
  0xfd   : > { %v804_v16 = vsel %vm459_vm1, %v768_v39, 0.0  ;;  %v771_v44 = vsel %vm755_vm15, %v1940_v24, 0.0 }
  0xfe   : > { %578 = vadd.xlane.f32.xlu1 %v577_v45  ;;  %563 = vadd.xlane.f32.xlu0 %v562_v41  ;;  %v726_v35 = vpop.permute.xlu0 %725  ;;  %v769_v41 = vsel %vm753_vm13, %v1930_v20, 0.0  ;;  %v813_v20 = vsel %vm459_vm1, %v771_v44, 0.0 }
  0xff   : > { %vm754_vm14 = vcmp.eq.s32.totalorder %v1992_v7, %v726_v35  ;;  %v741_v18 = vpop.permute.xlu1 %740  ;;  %v807_v22 = vsel %vm459_vm1, %v769_v41, 0.0 }
 0x100   : > { %v770_v42 = vsel %vm754_vm14, %v1945_v26, 0.0  ;;  %vm757_vm2 = vcmp.eq.s32.totalorder %v1992_v7, %v741_v18 }
 0x101   : > { %v1431_v13 = vpop.eup %1430  ;;  %v810_v43 = vsel %vm459_vm1, %v770_v42, 0.0  ;;  %v773_v46 = vsel %vm757_vm2, %v1950_v28, 0.0 }
 0x102   : > { %584 = vadd.xlane.f32.xlu1 %v583_v48  ;;  %566 = vadd.xlane.f32.xlu0 %v565_v49  ;;  %v1433_v19 = vpop.eup %1432  ;;  %v580_v8 = vsel %vm459_vm1, %v1431_v13, 0.0  ;;  %v737_v1 = vpop.permute.xlu0 %736  ;;  %v819_v47 = vsel %vm459_vm1, %v773_v46, 0.0 }
 0x103   : > { %v1435_v21 = vpop.eup %1434  ;;  %v595_v23 = vsel %vm459_vm1, %v1433_v19, 0.0  ;;  %vm756_vm0 = vcmp.eq.s32.totalorder %v1992_v7, %v737_v1 }
 0x104   : > { %v1437_v25 = vpop.eup %1436  ;;  %v586_v12 = vsel %vm459_vm1, %v1435_v21, 0.0  ;;  %v772_v45 = vsel %vm756_vm0, %v1955_v30, 0.0 }
 0x105   : > { %v598_v27 = vsel %vm459_vm1, %v1437_v25, 0.0  ;;  %v1439_v29 = vpop.eup %1438  ;;  %v816_v26 = vsel %vm459_vm1, %v772_v45, 0.0 }
 0x106   : > { %590 = vadd.xlane.f32.xlu1 %v589_v51  ;;  %569 = vadd.xlane.f32.xlu0 %v568_v11  ;;  %v601_v14 = vsel %vm459_vm1, %v1439_v29, 0.0 }
 0x10a   : > { %593 = vadd.xlane.f32.xlu1 %v592_v15  ;;  %575 = vadd.xlane.f32.xlu0 %v574_v17 }
 0x10e   : > { %596 = vadd.xlane.f32.xlu1 %v595_v23  ;;  %581 = vadd.xlane.f32.xlu0 %v580_v8 }
 0x112   : > { %599 = vadd.xlane.f32.xlu1 %v598_v27  ;;  %587 = vadd.xlane.f32.xlu0 %v586_v12 }
 0x116   : > { %602 = vadd.xlane.f32.xlu1 %v601_v14 }
 0x127   : > { %457 = vbcast.lane.b32.xlu1 %v1289_v31, 264 }
 0x128   : > { %453 = vbcast.lane.b32.xlu0 %v1289_v31, 256 }
 0x147   : > { %802 = vadd.xlane.f32.xlu0 %v801_v4 }
 0x14b   : > { %799 = vadd.xlane.f32.xlu1 %v798_v40  ;;  %805 = vadd.xlane.f32.xlu0 %v804_v16 }
 0x14f   : > { %808 = vadd.xlane.f32.xlu1 %v807_v22  ;;  %811 = vadd.xlane.f32.xlu0 %v810_v43 }
 0x153   : > { %814 = vadd.xlane.f32.xlu1 %v813_v20  ;;  %817 = vadd.xlane.f32.xlu0 %v816_v26 }
 0x157   : > { %820 = vadd.xlane.f32.xlu1 %v819_v47 }
 0x16b   : > { %v779_v48 = vpop.xlane.xlu0 %778  ;;  %v776_v24 = vpop.xlane.xlu1 %775 }
 0x16f   : > { %v782_v49 = vpop.xlane.xlu0 %781 }
 0x173   : > { %v2097_v2 = vpop.xlane.xlu0 %784 }
 0x177   : > { %v2099_v50 = vpop.xlane.xlu0 %787 }
 0x17b   : > { %v2101_v30 = vpop.xlane.xlu1 %796  ;;  %v2103_v7 = vpop.xlane.xlu0 %790 }
 0x17f   : > { %v561_v51 = vpop.xlane.xlu1 %560  ;;  %v2105_v11 = vpop.xlane.xlu0 %793 }
 0x180   : > { %1440 = vlog2.f32 %v561_v51 }
 0x183   : > { %v573_v10 = vpop.xlane.xlu1 %572  ;;  %v558_v13 = vpop.xlane.xlu0 %557 }
 0x184   : > { %1442 = vlog2.f32 %v558_v13 }
 0x187   : > { %v579_v28 = vpop.xlane.xlu1 %578  ;;  %v564_v15 = vpop.xlane.xlu0 %563 }
 0x188   : > { %1444 = vlog2.f32 %v564_v15 }
 0x18b   : > { %v585_v17 = vpop.xlane.xlu1 %584  ;;  %v567_v21 = vpop.xlane.xlu0 %566 }
 0x18c   : > { %1446 = vlog2.f32 %v567_v21 }
 0x18d   : > { %v1441_v14 = vpop.eup %1440 }
 0x18e   : > { %v607_v33 = vmul.f32 0.6931472, %v1441_v14 }
 0x18f   : > { %v591_v19 = vpop.xlane.xlu1 %590  ;;  %v570_v8 = vpop.xlane.xlu0 %569 }
 0x190   : > { %1448 = vlog2.f32 %v570_v8  ;;  %v637_v36 = vadd.f32 %v607_v33, %v1968_v55 }
 0x191   : > { %1450 = vlog2.f32 %v573_v10  ;;  %v1443_v32 = vpop.eup %1442 }
 0x192   : > { %v605_v34 = vmul.f32 0.6931472, %v1443_v32  ;;  %v823_v16 = vsub.f32 %v637_v36, %v779_v48 }
 0x193   : > { %v594_v23 = vpop.xlane.xlu1 %593  ;;  %v576_v27 = vpop.xlane.xlu0 %575 }
 0x194   : > { %1452 = vlog2.f32 %v576_v27  ;;  %v636_v38 = vadd.f32 %v605_v34, %v1964_v53 }
 0x195   : > { %v1445_v35 = vpop.eup %1444  ;;  %1454 = vlog2.f32 %v579_v28 }
 0x196   : > { %v609_v39 = vmul.f32 0.6931472, %v1445_v35  ;;  %v822_v18 = vsub.f32 %v636_v38, %v776_v24  ;;  %1456 = vlog2.f32 %v585_v17 }
 0x197   : > { %v597_v25 = vpop.xlane.xlu1 %596  ;;  %v582_v29 = vpop.xlane.xlu0 %581  ;;  %1458 = vlog2.f32 %v591_v19 }
 0x198   : > { %v638_v22 = vadd.f32 %v609_v39, %v1962_v52 }
 0x199   : > { %v1447_v37 = vpop.eup %1446 }
 0x19a   : > { %v611_v42 = vmul.f32 0.6931472, %v1447_v37  ;;  %v824_v26 = vsub.f32 %v638_v22, %v782_v49 }
 0x19b   : > { %v2107_v12 = vpop.xlane.xlu1 %599  ;;  %v588_v5 = vpop.xlane.xlu0 %587 }
 0x19c   : > { %v639_v45 = vadd.f32 %v611_v42, %v1966_v54 }
 0x19d   : > { %v1449_v40 = vpop.eup %1448 }
 0x19e   : > { %v1451_v41 = vpop.eup %1450  ;;  %v613_v55 = vmul.f32 0.6931472, %v1449_v40  ;;  %v825_v10 = vsub.f32 %v639_v45, %v2097_v2 }
 0x19f   : > { %v603_v31 = vpop.xlane.xlu1 %602  ;;  %v2113_v1 = vpop.permute.xlu0 %453  ;;  %v615_v53 = vmul.f32 0.6931472, %v1451_v41 }
 0x1a0   : > { %vm838_vm3 = vcmp.gt.f32.partialorder %v2113_v1, 0.0  ;;  %v640_v46 = vadd.f32 %v613_v55, %v1972_v57  ;;  %v841_v54 = vmul.f32 %v822_v18, %v2113_v1  ;;  %v843_v2 = vmul.f32 %v824_v26, %v2113_v1 }
 0x1a1   : > { %v907_v44 = vsel %vm838_vm3, %v822_v18, 0.0  ;;  %v1453_v47 = vpop.eup %1452  ;;  %v641_v24 = vadd.f32 %v615_v53, %v1970_v56  ;;  %v909_v51 = vsel %vm838_vm3, %v824_v26, 0.0 }
 0x1a2   : > { %v923_v52 = vmul.f32 1.442695, %v907_v44  ;;  %v826_v49 = vsub.f32 %v640_v46, %v2099_v50  ;;  %v617_v57 = vmul.f32 0.6931472, %v1453_v47  ;;  %v927_v56 = vmul.f32 1.442695, %v909_v51  ;;  %v1455_v27 = vpop.eup %1454 }
 0x1a3   : > { %v2110_v4 = vpop.permute.xlu1 %457  ;;  %v827_v15 = vsub.f32 %v641_v24, %v2103_v7  ;;  %v858_v17 = vsel %vm857_vm4, %v841_v54, 0.0  ;;  %v619_v33 = vmul.f32 0.6931472, %v1455_v27 }
 0x1a4   : > { %vm839_vm1 = vcmp.gt.f32.partialorder %v2110_v4, 0.0  ;;  %v842_v48 = vmul.f32 %v823_v16, %v2110_v4  ;;  %v911_v8 = vsel %vm838_vm3, %v826_v49, 0.0  ;;  %v845_v35 = vmul.f32 %v826_v49, %v2113_v1 }
 0x1a5   : > { %v908_v43 = vsel %vm839_vm1, %v823_v16, 0.0  ;;  %v910_v13 = vsel %vm839_vm1, %v825_v10, 0.0  ;;  %v912_v50 = vsel %vm839_vm1, %v827_v15, 0.0  ;;  %v931_v32 = vmul.f32 1.442695, %v911_v8 }
 0x1a6   : > { %v925_v20 = vmul.f32 1.442695, %v908_v43  ;;  %v859_v28 = vsel %vm857_vm4, %v842_v48, 0.0  ;;  %v929_v19 = vmul.f32 1.442695, %v910_v13  ;;  %v643_v38 = vadd.f32 %v619_v33, %v1974_v58 }
 0x1a7   : > { %v860_v21 = vadd.f32 %v859_v28, %v858_v17  ;;  %v933_v7 = vmul.f32 1.442695, %v912_v50  ;;  %v865_v42 = vsel %vm857_vm4, %v845_v35, 0.0 }
 0x1a8   : > { %1460 = vpow2.f32 %v925_v20  ;;  %v829_v44 = vsub.f32 %v643_v38, %v2101_v30 }
 0x1a9   : > { %1462 = vlog2.f32 %v594_v23  ;;  %v642_v23 = vadd.f32 %v617_v57, %v1976_v59  ;;  %v1457_v59 = vpop.eup %1456 }
 0x1aa   : > { %1464 = vpow2.f32 %v923_v52  ;;  %v1459_v34 = vpop.eup %1458  ;;  %v623_v16 = vmul.f32 0.6931472, %v1457_v59  ;;  %v914_v47 = vsel %vm839_vm1, %v829_v44, 0.0  ;;  %v848_v30 = vmul.f32 %v829_v44, %v2110_v4 }
 0x1ab   : > { %1466 = vlog2.f32 %v597_v25  ;;  %v844_v25 = vmul.f32 %v825_v10, %v2110_v4  ;;  %v627_v20 = vmul.f32 0.6931472, %v1459_v34 }
 0x1ac   : > { %1468 = vlog2.f32 %v582_v29  ;;  %v861_v29 = vsel %vm857_vm4, %v843_v2, 0.0  ;;  %v645_v26 = vadd.f32 %v623_v16, %v1978_v60 }
 0x1ad   : > { %1470 = vlog2.f32 %v588_v5  ;;  %v862_v14 = vadd.f32 %v861_v29, %v860_v21  ;;  %v828_v5 = vsub.f32 %v642_v23, %v2105_v11  ;;  %v863_v36 = vsel %vm857_vm4, %v844_v25, 0.0 }
 0x1ae   : > { %1472 = vpow2.f32 %v927_v56  ;;  %v846_v11 = vmul.f32 %v827_v15, %v2110_v4  ;;  %v937_v15 = vmul.f32 1.442695, %v914_v47  ;;  %v647_v17 = vadd.f32 %v627_v20, %v1982_v62 }
 0x1af   : > { %1474 = vlog2.f32 %v2107_v12  ;;  %v913_v39 = vsel %vm838_vm3, %v828_v5, 0.0  ;;  %v847_v48 = vmul.f32 %v828_v5, %v2113_v1 }
 0x1b0   : > { %1476 = vlog2.f32 %v603_v31  ;;  %v864_v31 = vadd.f32 %v863_v36, %v862_v14  ;;  %v935_v43 = vmul.f32 1.442695, %v913_v39  ;;  %v867_v52 = vsel %vm857_vm4, %v846_v11, 0.0 }
 0x1b1   : > { %1478 = vpow2.f32 %v929_v19  ;;  %v869_v8 = vsel %vm857_vm4, %v847_v48, 0.0 }
 0x1b2   : > { %1480 = vpow2.f32 %v933_v7  ;;  %v866_v55 = vadd.f32 %v865_v42, %v864_v31  ;;  %v871_v7 = vsel %vm857_vm4, %v848_v30, 0.0 }
 0x1b3   : > { %1482 = vpow2.f32 %v931_v32 }
 0x1b4   : > { %v868_v54 = vadd.f32 %v867_v52, %v866_v55  ;;  %1484 = vpow2.f32 %v935_v43 }
 0x1b5   : > { %v1461_v12 = vpop.eup %1460  ;;  %1486 = vpow2.f32 %v937_v15 }
 0x1b6   : > { %v1463_v37 = vpop.eup %1462  ;;  %v956_v18 = vmul.f32 %v1461_v12, %v2110_v4  ;;  %v870_v29 = vadd.f32 %v869_v8, %v868_v54 }
 0x1b7   : > { %v1465_v40 = vpop.eup %1464  ;;  %v629_v57 = vmul.f32 0.6931472, %v1463_v37 }
 0x1b8   : > { %v1467_v41 = vpop.eup %1466  ;;  %v955_v58 = vmul.f32 %v1465_v40, %v2113_v1  ;;  %v972_v24 = vsel %vm857_vm4, %v956_v18, 0.0  ;;  %v872_v40 = vadd.f32 %v871_v7, %v870_v29 }
 0x1b9   : > { %v1469_v22 = vpop.eup %1468  ;;  %v631_v56 = vmul.f32 0.6931472, %v1467_v41  ;;  %v648_v5 = vadd.f32 %v629_v57, %v1988_v3 }
 0x1ba   : > { %v1471_v53 = vpop.eup %1470  ;;  %v621_v10 = vmul.f32 0.6931472, %v1469_v22  ;;  %v971_v28 = vsel %vm857_vm4, %v955_v58, 0.0 }
 0x1bb   : > { %v1473_v45 = vpop.eup %1472  ;;  %v625_v13 = vmul.f32 0.6931472, %v1471_v53  ;;  %v973_v50 = vadd.f32 %v972_v24, %v971_v28  ;;  %v649_v12 = vadd.f32 %v631_v56, %v1986_v0 }
 0x1bc   : > { %v1475_v46 = vpop.eup %1474  ;;  %v957_v60 = vmul.f32 %v1473_v45, %v2113_v1  ;;  %v644_v25 = vadd.f32 %v621_v10, %v1980_v61 }
 0x1bd   : > { %v1477_v51 = vpop.eup %1476  ;;  %v633_v19 = vmul.f32 0.6931472, %v1475_v46  ;;  %v646_v62 = vadd.f32 %v625_v13, %v1984_v63 }
 0x1be   : > { %v1479_v49 = vpop.eup %1478  ;;  %v635_v21 = vmul.f32 0.6931472, %v1477_v51  ;;  %v974_v59 = vsel %vm857_vm4, %v957_v60, 0.0 }
 0x1bf   : > { %v1481_v27 = vpop.eup %1480  ;;  %v958_v14 = vmul.f32 %v1479_v49, %v2110_v4  ;;  %v975_v61 = vadd.f32 %v974_v59, %v973_v50  ;;  %v650_v38 = vadd.f32 %v633_v19, %v1994_v9 }
 0x1c0   : > { %v1483_v32 = vpop.eup %1482  ;;  %v651_v39 = vadd.f32 %v635_v21, %v1990_v6  ;;  %v960_v3 = vmul.f32 %v1481_v27, %v2110_v4 }
 0x1c1   : > { %v959_v63 = vmul.f32 %v1483_v32, %v2113_v1  ;;  %v976_v16 = vsel %vm857_vm4, %v958_v14, 0.0  ;;  %v1485_v46 = vpop.eup %1484 }
 0x1c2   : > { %v977_v55 = vadd.f32 %v976_v16, %v975_v61 }
 0x1c3   : > { %v978_v20 = vsel %vm857_vm4, %v959_v63, 0.0 }
 0x1c4   : > { %v979_v49 = vadd.f32 %v978_v20, %v977_v55  ;;  %v1015_v55 = vsel %vm857_vm4, %v2113_v1, 0.0 }
 0x1d0   : > { %v803_v2 = vpop.xlane.xlu0 %802 }
 0x1d1   : > { %v831_v23 = vsub.f32 %v645_v26, %v803_v2  ;;  %v980_v26 = vsel %vm857_vm4, %v960_v3, 0.0  ;;  %v961_v2 = vmul.f32 %v1485_v46, %v2113_v1 }
 0x1d2   : > { %v981_v7 = vadd.f32 %v980_v26, %v979_v49 }
 0x1d3   : > { %v916_v33 = vsel %vm839_vm1, %v831_v23, 0.0  ;;  %v850_v41 = vmul.f32 %v831_v23, %v2110_v4  ;;  %v982_v61 = vsel %vm857_vm4, %v961_v2, 0.0 }
 0x1d4   : > { %v941_v34 = vmul.f32 1.442695, %v916_v33  ;;  %v800_v35 = vpop.xlane.xlu1 %799  ;;  %v806_v36 = vpop.xlane.xlu0 %805 }
 0x1d5   : > { %v830_v31 = vsub.f32 %v644_v25, %v800_v35  ;;  %v832_v37 = vsub.f32 %v646_v62, %v806_v36  ;;  %v875_v47 = vsel %vm857_vm4, %v850_v41, 0.0  ;;  %v1487_v25 = vpop.eup %1486 }
 0x1d6   : > { %1488 = vpow2.f32 %v941_v34 }
 0x1d7   : > { %v849_v11 = vmul.f32 %v830_v31, %v2113_v1  ;;  %v915_v0 = vsel %vm838_vm3, %v830_v31, 0.0  ;;  %v917_v42 = vsel %vm838_vm3, %v832_v37, 0.0  ;;  %v851_v53 = vmul.f32 %v832_v37, %v2113_v1 }
 0x1d8   : > { %v939_v9 = vmul.f32 1.442695, %v915_v0  ;;  %v943_v6 = vmul.f32 1.442695, %v917_v42  ;;  %v809_v18 = vpop.xlane.xlu1 %808  ;;  %v812_v22 = vpop.xlane.xlu0 %811  ;;  %v1016_v42 = vsel %vm857_vm4, %v2110_v4, 0.0 }
 0x1d9   : > { %v873_v43 = vsel %vm857_vm4, %v849_v11, 0.0  ;;  %v833_v44 = vsub.f32 %v647_v17, %v809_v18  ;;  %v834_v58 = vsub.f32 %v648_v5, %v812_v22  ;;  %v877_v57 = vsel %vm857_vm4, %v851_v53, 0.0 }
 0x1da   : > { %v874_v45 = vadd.f32 %v873_v43, %v872_v40  ;;  %1490 = vpow2.f32 %v939_v9 }
 0x1db   : > { %1492 = vpow2.f32 %v943_v6  ;;  %v852_v48 = vmul.f32 %v833_v44, %v2110_v4  ;;  %v918_v52 = vsel %vm839_vm1, %v833_v44, 0.0  ;;  %v919_v10 = vsel %vm838_vm3, %v834_v58, 0.0 }
 0x1dc   : > { %v876_v24 = vadd.f32 %v875_v47, %v874_v45  ;;  %v945_v51 = vmul.f32 1.442695, %v918_v52  ;;  %v815_v30 = vpop.xlane.xlu1 %814  ;;  %v818_v54 = vpop.xlane.xlu0 %817  ;;  %v853_v13 = vmul.f32 %v834_v58, %v2113_v1  ;;  %v947_v60 = vmul.f32 1.442695, %v919_v10 }
 0x1dd   : > { %v835_v28 = vsub.f32 %v649_v12, %v815_v30  ;;  %v836_v15 = vsub.f32 %v650_v38, %v818_v54  ;;  %v879_v17 = vsel %vm857_vm4, %v852_v48, 0.0  ;;  %v962_v12 = vmul.f32 %v1487_v25, %v2110_v4 }
 0x1de   : > { %v878_v56 = vadd.f32 %v877_v57, %v876_v24  ;;  %1494 = vpow2.f32 %v945_v51  ;;  %v881_v29 = vsel %vm857_vm4, %v853_v13, 0.0  ;;  %v983_v38 = vadd.f32 %v982_v61, %v981_v7  ;;  %v840_v61 = vld [vmem:[#allocation2] sm:$0x1] }
 0x1df   : > { %1496 = vpow2.f32 %v947_v60  ;;  %v854_v50 = vmul.f32 %v835_v28, %v2110_v4  ;;  %v920_v19 = vsel %vm839_vm1, %v835_v28, 0.0  ;;  %v921_v8 = vsel %vm838_vm3, %v836_v15, 0.0 }
 0x1e0   : > { %v880_v21 = vadd.f32 %v879_v17, %v878_v56  ;;  %v949_v23 = vmul.f32 1.442695, %v920_v19  ;;  %v821_v27 = vpop.xlane.xlu1 %820  ;;  %v855_v14 = vmul.f32 %v836_v15, %v2113_v1  ;;  %v951_v32 = vmul.f32 1.442695, %v921_v8 }
 0x1e1   : > { %v837_v33 = vsub.f32 %v651_v39, %v821_v27  ;;  %v883_v5 = vsel %vm857_vm4, %v854_v50, 0.0  ;;  %v984_v0 = vsel %vm857_vm4, %v962_v12, 0.0  ;;  %v1017_v44 = vadd.f32 %v1016_v42, %v1015_v55 }
 0x1e2   : > { %v882_v62 = vadd.f32 %v881_v29, %v880_v21  ;;  %1498 = vpow2.f32 %v949_v23  ;;  %v885_v37 = vsel %vm857_vm4, %v855_v14, 0.0  ;;  %v985_v9 = vadd.f32 %v984_v0, %v983_v38  ;;  %v902_v38 = vld [vmem:[#allocation3] sm:$0x1] }
 0x1e3   : > { %1500 = vpow2.f32 %v951_v32  ;;  %v856_v59 = vmul.f32 %v837_v33, %v2110_v4  ;;  %v922_v34 = vsel %vm839_vm1, %v837_v33, 0.0  ;;  %v1489_v31 = vpop.eup %1488 }
 0x1e4   : > { %v953_v35 = vmul.f32 1.442695, %v922_v34  ;;  %v884_v36 = vadd.f32 %v883_v5, %v882_v62  ;;  %v964_v11 = vmul.f32 %v1489_v31, %v2110_v4 }
 0x1e5   : > { %v887_v63 = vsel %vm857_vm4, %v856_v59, 0.0 }
 0x1e6   : > { %1502 = vpow2.f32 %v953_v35  ;;  %v886_v39 = vadd.f32 %v885_v37, %v884_v36  ;;  %v988_v45 = vsel %vm857_vm4, %v964_v11, 0.0  ;;  %v1034_v11 = vld [vmem:[%s2333_s3 + $0x8] sm:$0xff] (%p421_p10) }
 0x1e7   : > { %v1491_v40 = vpop.eup %1490  ;;  %v1036_v42 = vadd.f32 (%p421_p10), 1e-07, %v1034_v11 }
 0x1e8   : > { %v1493_v3 = vpop.eup %1492  ;;  %v963_v16 = vmul.f32 %v1491_v40, %v2113_v1  ;;  %v888_v41 = vadd.f32 %v887_v63, %v886_v39  ;;  %v1014_v63 = vld [vmem:[#allocation4] sm:$0x1] }
 0x1e9   : > { %v965_v6 = vmul.f32 %v1493_v3, %v2113_v1 }
 0x1ea   : > { %889 = vadd.xlane.f32.xlu0 %v888_v41  ;;  %v986_v18 = vsel %vm857_vm4, %v963_v16, 0.0  ;;  %v1033_v41 = vld [vmem:[%s2333_s3] sm:$0xff] (%p421_p10) }
 0x1eb   : > { %v1495_v22 = vpop.eup %1494  ;;  %v987_v43 = vadd.f32 %v986_v18, %v985_v9  ;;  %v990_v46 = vsel %vm857_vm4, %v965_v6, 0.0  ;;  %v1035_v0 = vadd.f32 (%p421_p10), 1e-07, %v1033_v41  ;;  %v1063_v9 = vld [vmem:[%s2335_s5] sm:$0x3] (%p421_p10) }
 0x1ec   : > { %v1497_v53 = vpop.eup %1496  ;;  %v966_v58 = vmul.f32 %v1495_v22, %v2110_v4  ;;  %v1067_v6 = vmul.f32 (%p421_p10), 1.442695, %v1063_v9  ;;  %v1062_v18 = vld [vmem:[%s2334_s4] sm:$0x3] (%p421_p10)  ;;  %v1064_v55 = vadd.f32 (%p421_p10), 1.0, %v1063_v9 }
 0x1ed   : > { %v989_v20 = vadd.f32 %v988_v45, %v987_v43  ;;  %v967_v26 = vmul.f32 %v1497_v53, %v2113_v1  ;;  %1504 = vlog2.f32 (%p421_p10), %v1035_v0  ;;  %v1065_v43 = vmul.f32 (%p421_p10), %v1062_v18, %v1062_v18 }
 0x1ee   : > { %1018 = vadd.xlane.f32.xlu0 %v1017_v44  ;;  %v992_v51 = vsel %vm857_vm4, %v966_v58, 0.0  ;;  %1506 = vlog2.f32 (%p421_p10), %v1036_v42 }
 0x1ef   : > { %v1499_v47 = vpop.eup %1498  ;;  %v991_v48 = vadd.f32 %v990_v46, %v989_v20  ;;  %v994_v54 = vsel %vm857_vm4, %v967_v26, 0.0  ;;  %1508 = vpow2.f32 (%p421_p10), %v1067_v6  ;;  %v1066_v26 = vsub.f32 (%p421_p10), %v1064_v55, %v1065_v43 }
 0x1f0   : > { %v1501_v52 = vpop.eup %1500  ;;  %v968_v24 = vmul.f32 %v1499_v47, %v2110_v4 }
 0x1f1   : > { %v993_v10 = vadd.f32 %v992_v51, %v991_v48  ;;  %v969_v30 = vmul.f32 %v1501_v52, %v2113_v1 }
 0x1f2   : > { %v996_v60 = vsel %vm857_vm4, %v968_v24, 0.0 }
 0x1f3   : > { %v1503_v49 = vpop.eup %1502  ;;  %v995_v57 = vadd.f32 %v994_v54, %v993_v10  ;;  %v998_v56 = vsel %vm857_vm4, %v969_v30, 0.0 }
 0x1f4   : > { %v970_v13 = vmul.f32 %v1503_v49, %v2110_v4 }
 0x1f5   : > { %v997_v28 = vadd.f32 %v996_v60, %v995_v57 }
 0x1f6   : > { %v1000_v2 = vsel %vm857_vm4, %v970_v13, 0.0 }
 0x1f7   : > { %v999_v15 = vadd.f32 %v998_v56, %v997_v28 }
 0x1f9   : > { %v1001_v17 = vadd.f32 %v1000_v2, %v999_v15 }
 0x1fa   : > { %v1505_v22 = vpop.eup (%p421_p10), %1504 }
 0x1fb   : > { %1002 = vadd.xlane.f32.xlu1 %v1001_v17  ;;  %v1507_v53 = vpop.eup (%p421_p10), %1506  ;;  %v1038_v44 = vmul.f32 (%p421_p10), 0.6931472, %v1505_v22 }
 0x1fc   : > { %v1040_v58 = vmul.f32 (%p421_p10), 0.6931472, %v1507_v53  ;;  %v1509_v46 = vpop.eup (%p421_p10), %1508 }
 0x1fd   : > { %v1041_v45 = vmax.f32 (%p421_p10), %v1038_v44, -100.0  ;;  %v1069_v51 = vsub.f32 (%p421_p10), %v1066_v26, %v1509_v46 }
 0x1fe   : > { %v1042_v20 = vmax.f32 (%p421_p10), %v1040_v58, -100.0 }
 0x1ff   : > { %v1043_v47 = vmul.f32 (%p421_p10), %v1041_v45, %v1035_v0  ;;  %v1071_v30 = vsel (%p421_p10), %vm1070_vm7, %v1069_v51, 0.0 }
 0x200   : > { %v1044_v48 = vmul.f32 (%p421_p10), %v1042_v20, %v1036_v42 }
 0x201   : > { %v1046_v52 = vsel (%p421_p10), %vm1045_vm6, %v1043_v47, 0.0 }
 0x202   : > { %v1047_v24 = vsel (%p421_p10), %vm1045_vm6, %v1044_v48, 0.0 }
 0x203   : > { %v1048_v10 = vadd.f32 (%p421_p10), %v1047_v24, %v1046_v52 }
 0x205   : > { %1049 = vadd.xlane.f32.xlu0 (%p421_p10), %v1048_v10 }
 0x209   : > { %1072 = vadd.xlane.f32.xlu0 (%p421_p10), %v1071_v30 }
 0x273   : > { %v890_v50 = vpop.xlane.xlu0 %889 }
 0x274   : > { %v891_v19 = vrot.slane %v890_v50, 4 }
 0x276   : > { %v892_v21 = vadd.f32 %v891_v19, %v890_v50 }
 0x277   : > { %v1019_v23 = vpop.xlane.xlu0 %1018 }
 0x278   : > { %v893_v1 = vrot.slane %v892_v21, 2  ;;  %v1020_v27 = vrot.slane %v1019_v23, 4 }
 0x27a   : > { %v894_v8 = vadd.f32 %v893_v1, %v892_v21  ;;  %v1021_v4 = vadd.f32 %v1020_v27, %v1019_v23 }
 0x27c   : > { %v895_v7 = vrot.slane %v894_v8, 1  ;;  %v1022_v29 = vrot.slane %v1021_v4, 2 }
 0x27e   : > { %v896_v25 = vadd.f32 %v895_v7, %v894_v8  ;;  %v1023_v62 = vadd.f32 %v1022_v29, %v1021_v4 }
 0x280   : > { %1305 = vpush %v896_v25  ;;  %v1024_v34 = vrot.slane %v1023_v62, 1 }
 0x282   : > { %v1025_v12 = vadd.f32 %v1024_v34, %v1023_v62 }
 0x284   : > { %v1003_v14 = vpop.xlane.xlu1 %1002 }
 0x285   : > { %v1004_v32 = vrot.slane %v1003_v14, 4 }
 0x287   : > { %v1005_v33 = vadd.f32 %v1004_v32, %v1003_v14 }
 0x289   : > { %v1006_v5 = vrot.slane %v1005_v33, 2 }
 0x28b   : > { %v1007_v59 = vadd.f32 %v1006_v5, %v1005_v33 }
 0x28d   : > { %v1008_v35 = vrot.slane %v1007_v59, 1 }
 0x28e   : > { %v1050_v56 = vpop.xlane.xlu0 (%p421_p10), %1049 }
 0x28f   : > { %v1009_v36 = vadd.f32 %v1008_v35, %v1007_v59  ;;  %v1051_v15 = vrot.slane (%p421_p10), %v1050_v56, 4 }
 0x291   : > { %1307 = vpush %v1009_v36  ;;  %v1052_v2 = vadd.f32 (%p421_p10), %v1051_v15, %v1050_v56 }
 0x292   : > { %1309 = vpush %v1025_v12  ;;  %v1073_v17 = vpop.xlane.xlu0 (%p421_p10), %1072 }
 0x293   : > { %v1053_v50 = vrot.slane (%p421_p10), %v1052_v2, 2  ;;  %v1074_v19 = vrot.slane (%p421_p10), %v1073_v17, 4 }
 0x295   : > { %v1075_v21 = vadd.f32 (%p421_p10), %v1074_v19, %v1073_v17  ;;  %v1054_v1 = vadd.f32 (%p421_p10), %v1053_v50, %v1052_v2 }
 0x297   : > { %v1076_v23 = vrot.slane (%p421_p10), %v1075_v21, 2  ;;  %v1055_v8 = vrot.slane (%p421_p10), %v1054_v1, 1 }
 0x299   : > { %v1077_v27 = vadd.f32 (%p421_p10), %v1076_v23, %v1075_v21  ;;  %v1056_v7 = vadd.f32 (%p421_p10), %v1055_v8, %v1054_v1 }
 0x29b   : > { %1311 = vpush (%p421_p10), %v1056_v7  ;;  %v1078_v25 = vrot.slane (%p421_p10), %v1077_v27, 1 }
 0x29d   : > { %v1079_v4 = vadd.f32 (%p421_p10), %v1078_v25, %v1077_v27 }
 0x29f   : > { %1313 = vpush (%p421_p10), %v1079_v4 }
 0x2b1   : > { %s1306_s26 = spop %1305 }
 0x2b2   : > { %v898_v31 = vstv %s1306_s26 }
 0x2b3   : > { %v899_v37 = vadd.f32 %v898_v31, %v840_v61 }
 0x2b5   : > { %901 = vst.msk [vmem:[#allocation2] sm:$0x1] %vm900_vm5, %v899_v37 }
 0x2bc   : > { %v1088_v49 = vld [vmem:[#allocation2] sm:$0x1] (%p421_p10) }
 0x2c2   : > { %s1308_s20 = spop %1307 }
 0x2c3   : > { %v1011_v39 = vstv %s1308_s20  ;;  %s1310_s28 = spop %1309 }
 0x2c4   : > { %v1012_v40 = vadd.f32 %v1011_v39, %v902_v38  ;;  %s1027_s17 = smul.f32 8.0, %s1310_s28 }
 0x2c5   : > { %1032 = sbr.rel (!%p421_p10) target bundleno = 740 (0x2e4), region = 56 }
 0x2c6   : > { %1013 = vst.msk [vmem:[#allocation3] sm:$0x1] %vm900_vm5, %v1012_v40  ;;  %v1028_v3 = vstv %s1027_s17 }
 0x2c7   : > { %v1029_v16 = vadd.f32 %v1028_v3, %v1014_v63 }
 0x2c9   : > { %1030 = vst.msk [vmem:[#allocation4] sm:$0x1] %vm900_vm5, %v1029_v16 }
 0x2cc   : > { %s1312_s21 = spop %1311 }
 0x2cd   : > { %v1090_v57 = vld [vmem:[#allocation3] sm:$0x1]  ;;  %v1058_v29 = vstv %s1312_s21 }
 0x2ce   : > { %v1059_v14 = vmul.f32 -2.0, %v1058_v29 }
 0x2d0   : > { %v1085_v54 = vld [vmem:[#allocation4] sm:$0x1]  ;;  %v1061_v32 = vmul.f32 0.0625, %v1059_v14  ;;  %s1314_s24 = spop %1313 }
 0x2d1   : > { %1510 = vrcp.f32 %v1085_v54  ;;  %v1081_v33 = vstv %s1314_s24 }
 0x2d2   : > { %1096 = vst.msk [vmem:[#allocation11] sm:$0x1] %vm900_vm5, %v1061_v32  ;;  %v1082_v62 = vmul.f32 -0.5, %v1081_v33 }
 0x2d4   : > { %v1084_v5 = vmul.f32 0.5, %v1082_v62 }
 0x2d6   : > { %v1092_v59 = vmul.f32 0.11, %v1084_v5  ;;  %1097 = vst.msk [vmem:[#allocation12] sm:$0x1] %vm900_vm5, %v1084_v5 }
 0x2de   : > { %v1511_v13 = vpop.eup %1510 }
 0x2df   : > { %v1089_v60 = vmul.f32 %v1511_v13, %v1088_v49  ;;  %v1091_v28 = vmul.f32 %v1511_v13, %v1090_v57 }
 0x2e1   : > { %1095 = vst.msk [vmem:[#allocation9] sm:$0x1] %vm900_vm5, %v1089_v60  ;;  %1098 = vst.msk [vmem:[#allocation14] sm:$0x1] %vm900_vm5, %v1091_v28  ;;  %v1093_v34 = vadd.f32 %v1092_v59, %v1089_v60 }
 0x2e3   : > { %1094 = vst.msk [vmem:[#allocation8] sm:$0x1] %vm900_vm5, %v1093_v34 }
 0x2e4 PF: > { %s2349_s27 = sadd.s32 4294967295, %s1722_s18   ;;  %s1728_s26 = smov [#allocation9]  }
 0x2e5   : > { %p2261_p7 = scmp.eq.s32.totalorder %s2349_s27, 1  ;;  %s1117_s20 = sshll.u32 %s1728_s26, 4  ;;  %s1118_s20 = int_to_ptr.vmem [resolvable:$true] %s1117_s20 }
 0x2e6   : > { %s1729_s28 = smov [#allocation12]   ;;  %s1540_s29 = scalar_lea.vmem %s1118_s20, 16 }
 0x2e7   : > { %s1139_s17 = sshll.u32 %s1729_s28, 4  ;;  %p1541_p11 = scmp.ne.s32.totalorder %s1118_s20, %s1540_s29  ;;  %s1140_s17 = int_to_ptr.vmem [resolvable:$true] %s1139_s17 }
 0x2e8   : > { %s1546_s19 = scalar_lea.vmem %s1118_s20, 32  ;;  %p1547_p0 = scmp.lt.s32.totalorder %s1118_s20, %s1118_s20 }
 0x2e9   : > { %p1542_p12 = pnand %p1541_p11, %p2261_p7  ;;  %p1548_p1 = scmp.lt.s32.totalorder %s1546_s19, %s1540_s29 }
 0x2eb   : > { %p1543_p13 = pneg %p1542_p12  ;;  %p1549_p2 = por %p1548_p1, %p1547_p0 }
 0x2ed   : > { %p1550_p3 = pnand %p1549_p2, %p1543_p13 }
 0x2ef   : > { %1553 = shalt.err (!%p1550_p3)
}
 0x2f0   : > { %1320 = dma.vmem_to_hbm [thread:$0]  (%p2261_p7), %s1118_s20, 16, %s2337_s7, [#allocation10]  }
 0x2f1   : > { %s1564_s12 = scalar_lea.vmem %s1140_s17, 16  ;;  %s1570_s13 = scalar_lea.vmem %s1140_s17, 32 }
 0x2f2   : > { %p1565_p4 = scmp.ne.s32.totalorder %s1140_s17, %s1564_s12  ;;  %p1571_p8 = scmp.lt.s32.totalorder %s1140_s17, %s1140_s17 }
 0x2f3   : > { %p1572_p9 = scmp.lt.s32.totalorder %s1570_s13, %s1564_s12 }
 0x2f4   : > { %p1566_p5 = pnand %p1565_p4, %p2261_p7 }
 0x2f5   : > { %p1573_p10 = por %p1572_p9, %p1571_p8 }
 0x2f6   : > { %p1567_p6 = pneg %p1566_p5 }
 0x2f8   : > { %p1574_p11 = pnand %p1573_p10, %p1567_p6 }
 0x2fa   : > { %1577 = shalt.err (!%p1574_p11)
}
 0x2fb   : > { %1324 = dma.vmem_to_hbm [thread:$0]  (%p2261_p7), %s1140_s17, 16, %s2339_s9, [#allocation13]  }
 0x2fc   : > { %s1730_s21 = smov [#allocation8]   ;;  %s1731_s27 = smov [#allocation11]  }
 0x2fd   : > { %s1106_s24 = sshll.u32 %s1730_s21, 4  ;;  %s1128_s26 = sshll.u32 %s1731_s27, 4  ;;  %s1107_s24 = int_to_ptr.vmem [resolvable:$true] %s1106_s24  ;;  %s1129_s26 = int_to_ptr.vmem [resolvable:$true] %s1128_s26 }
 0x2fe   : > { %s1588_s20 = scalar_lea.vmem %s1107_s24, 16  ;;  %s1594_s28 = scalar_lea.vmem %s1107_s24, 32 }
 0x2ff   : > { %p1589_p12 = scmp.ne.s32.totalorder %s1107_s24, %s1588_s20  ;;  %p1595_p1 = scmp.lt.s32.totalorder %s1107_s24, %s1107_s24 }
 0x300   : > { %p1596_p2 = scmp.lt.s32.totalorder %s1594_s28, %s1588_s20 }
 0x301   : > { %p1590_p13 = pnand %p1589_p12, %p2261_p7 }
 0x302   : > { %p1597_p3 = por %p1596_p2, %p1595_p1 }
 0x303   : > { %p1591_p0 = pneg %p1590_p13 }
 0x305   : > { %p1598_p4 = pnand %p1597_p3, %p1591_p0 }
 0x307   : > { %1601 = shalt.err (!%p1598_p4)
}
 0x308   : > { %1318 = dma.vmem_to_hbm [thread:$0]  (%p2261_p7), %s1107_s24, 16, %s2336_s6, [#allocation7]  }
 0x309   : > { %s1612_s19 = scalar_lea.vmem %s1129_s26, 16  ;;  %s1618_s30 = scalar_lea.vmem %s1129_s26, 32 }
 0x30a   : > { %p1613_p5 = scmp.ne.s32.totalorder %s1129_s26, %s1612_s19  ;;  %p1619_p9 = scmp.lt.s32.totalorder %s1129_s26, %s1129_s26 }
 0x30b   : > { %p1620_p10 = scmp.lt.s32.totalorder %s1618_s30, %s1612_s19 }
 0x30c   : > { %p1614_p6 = pnand %p1613_p5, %p2261_p7 }
 0x30d   : > { %p1621_p11 = por %p1620_p10, %p1619_p9 }
 0x30e   : > { %p1615_p8 = pneg %p1614_p6 }
 0x310   : > { %p1622_p12 = pnand %p1621_p11, %p1615_p8 }
 0x312   : > { %1625 = shalt.err (!%p1622_p12)
}
 0x313   : > { %1322 = dma.vmem_to_hbm [thread:$0]  (%p2261_p7), %s1129_s26, 16, %s2338_s8, [#allocation10]  }
 0x314   : > { %s1732_s13 = smov [#allocation14]  }
 0x315   : > { %s1150_s16 = sshll.u32 %s1732_s13, 4  ;;  %s1151_s16 = int_to_ptr.vmem [resolvable:$true] %s1150_s16 }
 0x316   : > { %s1636_s23 = scalar_lea.vmem %s1151_s16, 16  ;;  %s1642_s21 = scalar_lea.vmem %s1151_s16, 32 }
 0x317   : > { %p1637_p13 = scmp.ne.s32.totalorder %s1151_s16, %s1636_s23  ;;  %p1643_p2 = scmp.lt.s32.totalorder %s1151_s16, %s1151_s16 }
 0x318   : > { %p1644_p3 = scmp.lt.s32.totalorder %s1642_s21, %s1636_s23 }
 0x319   : > { %p1638_p0 = pnand %p1637_p13, %p2261_p7 }
 0x31a   : > { %p1645_p4 = por %p1644_p3, %p1643_p2 }
 0x31b   : > { %p1639_p1 = pneg %p1638_p0 }
 0x31d   : > { %p1646_p5 = pnand %p1645_p4, %p1639_p1 }
 0x31f   : > { %1649 = shalt.err (!%p1646_p5)
}
 0x320   : > { %1326 = dma.vmem_to_hbm [thread:$0]  (%p2261_p7), %s1151_s16, 16, %s2340_s10, [#allocation13]  }
 0x321   : > { %1689 = dma.done.wait (%p2261_p7), [#allocation7], 16  }
 0x322   : > { %1691 = vsyncadd (%p2261_p7), [#allocation7], 4294967280 }
 0x323   : > { %1693 = dma.done.wait (%p2261_p7), [#allocation10], 32  }
 0x324   : > { %1695 = vsyncadd (%p2261_p7), [#allocation10], 4294967264 }
 0x325   : > { %1697 = dma.done.wait (%p2261_p7), [#allocation13], 32  }
 0x326   : > { %1699 = vsyncadd (%p2261_p7), [#allocation13], 4294967264 }
 0x327 PF: > { %s27_s18 = sadd.s32 1, %s1722_s18   ;;  %s2351_s16 = sld [smem:[#allocation19_spill]] }
 0x328   : > { %p24_p6 = scmp.ge.s32.totalorder %s27_s18, 4   ;;  %s2352_s17 = sld [smem:[#allocation20_spill]] }
 0x329   : > { %s2353_s13 = smov %s1706_s14  ;;  %s2354_s14 = smov %s1710_s15 }
 0x32a   : > { %s2355_s15 = smov %s1839_s25  ;;  %26 = sbr.rel (!%p24_p6) target bundleno = 7 (0x7), region = 127 }
 0x32f   :  { %1179 = vsyncpa [#allocation6], 1 }
 0x330   :  { %1181 = vsyncpa [#allocation6 + $0x1], 1 }
 0x331   :  { %1182 = vsyncpa [#allocation7], 1 }
 0x332   :  { %1184 = vsyncpa [#allocation7 + $0x1], 1 }
 0x333   :  { %1185 = vsyncpa [#allocation10], 1 }
 0x334   :  { %1186 = vsyncpa [#allocation13], 1 }

</bundles_post_ra>
